<compile_context>
chip_gen: v7x
topology: tpu7x:2x2x1
jax: 0.10.0
libtpu: 0.0.40
codegen_flags: <defaults>
</compile_context>

<pallas_src>
import functools

import jax
import jax.numpy as jnp
from jax.experimental import pallas as pl
from jax.experimental.pallas import tpu as pltpu

_VMEM_LIMIT_BYTES = 48 * 1024 * 1024
_BN_EPS = 1e-5


def _default_tiles():
    """Per-generation node / contraction tile sizes (MXU-row aligned)."""
    try:
        kind = jax.devices()[0].device_kind.lower()
    except Exception:  # pragma: no cover
        kind = ""
    if any(t in kind for t in ("v2", "v3", "v4", "v5")):
        tn = 128          # 128-wide MXU generations
    else:
        tn = 256          # v6e / v7x: 256-wide MXU
    tc = 256              # contraction (Npad) tile
    return tn, tc


# ----------------------------------------------------------------------------
# Pallas kernels
# ----------------------------------------------------------------------------
def _rel_proj_kernel(x_ref, w_ref, o_ref):
    """hr = x @ W_rel' for layer 0 (tiled over nodes)."""
    o_ref[...] = jnp.dot(x_ref[...], w_ref[...],
                         preferred_element_type=jnp.float32).astype(o_ref.dtype)


def _layer_kernel(h_ref, hr_ref, a_ref, w_root_ref, shift_ref, w_next_ref,
                  *rest):
    """Fused GraphConv + (bias+BN folded) shift + ReLU for one node tile.

    Grid = (node tiles, contraction tiles over Npad).
      j == 0      : acc  = h_tile @ W_root'
      every j     : acc += A_tile @ hr_tile          (A matmul is H wide)
      j == last   : y = relu(acc + shift)
                    [h_out = y]                       (skipped for last layer)
                    proj   = y @ W_next               (next layer's hr, or fc_w)
    """
    *out_refs, acc_ref = rest
    j = pl.program_id(1)

    @pl.when(j == 0)
    def _():
        acc_ref[...] = jnp.dot(h_ref[...], w_root_ref[...],
                               preferred_element_type=jnp.float32)

    acc_ref[...] += jnp.dot(a_ref[...], hr_ref[...],
                            preferred_element_type=jnp.float32)

    @pl.when(j == pl.num_programs(1) - 1)
    def _():
        y = jnp.maximum(acc_ref[...] + shift_ref[...], 0.0)   # f32 epilogue
        yb = y.astype(jnp.bfloat16)
        if len(out_refs) == 2:                                  # intermediate
            out_refs[0][...] = yb
        proj_ref = out_refs[-1]
        proj_ref[...] = jnp.dot(
            yb, w_next_ref[...],
            preferred_element_type=jnp.float32).astype(proj_ref.dtype)


def _pool_fc_kernel(p_ref, c_ref, b_ref, o_ref):
    """global_mean_pool of per-node FC contributions + bias: P @ (h@fc_w) + b."""
    o_ref[...] = (jnp.dot(p_ref[...], c_ref[...],
                          preferred_element_type=jnp.float32) + b_ref[...])


# ----------------------------------------------------------------------------
# Kernel wrappers
# ----------------------------------------------------------------------------
def rel_proj(x, w, *, tn):
    n_pad, k = x.shape
    h = w.shape[1]
    return pl.pallas_call(
        _rel_proj_kernel,
        out_shape=jax.ShapeDtypeStruct((n_pad, h), jnp.bfloat16),
        grid=(n_pad // tn,),
        in_specs=[pl.BlockSpec((tn, k), lambda i: (i, 0)),
                  pl.BlockSpec((k, h), lambda i: (0, 0))],
        out_specs=pl.BlockSpec((tn, h), lambda i: (i, 0)),
        compiler_params=pltpu.CompilerParams(
            dimension_semantics=("parallel",),
            vmem_limit_bytes=_VMEM_LIMIT_BYTES),
    )(x, w)


def graphconv_layer(h, hr, adj, w_root, shift, w_next, *, tn, tc,
                    proj_dtype, write_h):
    """One fused GraphConv+BN+ReLU layer (plus epilogue projection)."""
    n_pad, k_in = h.shape
    h_dim = w_root.shape[1]
    p_dim = w_next.shape[1]
    assert n_pad % tn == 0 and n_pad % tc == 0

    out_shape = []
    out_specs = []
    if write_h:
        out_shape.append(jax.ShapeDtypeStruct((n_pad, h_dim), jnp.bfloat16))
        out_specs.append(pl.BlockSpec((tn, h_dim), lambda i, j: (i, 0)))
    out_shape.append(jax.ShapeDtypeStruct((n_pad, p_dim), proj_dtype))
    out_specs.append(pl.BlockSpec((tn, p_dim), lambda i, j: (i, 0)))

    res = pl.pallas_call(
        _layer_kernel,
        out_shape=tuple(out_shape),
        grid=(n_pad // tn, n_pad // tc),
        in_specs=[
            pl.BlockSpec((tn, k_in), lambda i, j: (i, 0)),      # h node tile
            pl.BlockSpec((tc, h_dim), lambda i, j: (j, 0)),     # hr contraction tile
            pl.BlockSpec((tn, tc), lambda i, j: (i, j)),        # A tile
            pl.BlockSpec((k_in, h_dim), lambda i, j: (0, 0)),   # W_root' (resident)
            pl.BlockSpec((1, h_dim), lambda i, j: (0, 0)),      # shift   (resident)
            pl.BlockSpec((h_dim, p_dim), lambda i, j: (0, 0)),  # W_next  (resident)
        ],
        out_specs=tuple(out_specs),
        scratch_shapes=[pltpu.VMEM((tn, h_dim), jnp.float32)],
        compiler_params=pltpu.CompilerParams(
            dimension_semantics=("parallel", "arbitrary"),
            vmem_limit_bytes=_VMEM_LIMIT_BYTES),
    )(h, hr, adj, w_root, shift, w_next)

    if write_h:
        h_out, proj = res
        return h_out, proj
    return res[0] if isinstance(res, (tuple, list)) else res


def pool_fc(pool_mat, contrib, fc_b):
    g_pad, n_pad = pool_mat.shape
    return pl.pallas_call(
        _pool_fc_kernel,
        out_shape=jax.ShapeDtypeStruct((g_pad, 1), jnp.float32),
        grid=(1,),
        in_specs=[pl.BlockSpec((g_pad, n_pad), lambda i: (0, 0)),
                  pl.BlockSpec((n_pad, 1), lambda i: (0, 0)),
                  pl.BlockSpec((1, 1), lambda i: (0, 0))],
        out_specs=pl.BlockSpec((g_pad, 1), lambda i: (0, 0)),
        compiler_params=pltpu.CompilerParams(
            vmem_limit_bytes=_VMEM_LIMIT_BYTES),
    )(pool_mat, contrib, fc_b.reshape(1, 1))


# ----------------------------------------------------------------------------
# Forward pass (mirrors GraphRegressionModel.forward, inference mode)
# ----------------------------------------------------------------------------
def graph_regression_forward(params, x, edge_index, edge_weight, batch,
                             *, num_graphs, tn=None, tc=None):
    if tn is None or tc is None:
        d_tn, d_tc = _default_tiles()
        tn = d_tn if tn is None else tn
        tc = d_tc if tc is None else tc

    n_nodes, in_dim = x.shape
    num_layers = len(params["layers"])

    # Pad node count to a multiple of both tile sizes (>= 256, lane-dense A).
    pad_to = max(tn, tc, 256)
    n_pad = ((n_nodes + pad_to - 1) // pad_to) * pad_to
    # Pad the input feature dim to a full 128-lane contraction.
    k_pad = ((max(in_dim, 128) + 127) // 128) * 128

    x_p = jnp.pad(x.astype(jnp.float32),
                  ((0, n_pad - n_nodes), (0, k_pad - in_dim))
                  ).astype(jnp.bfloat16)

    # Dense weighted adjacency: A[dst, src] = edge_weight (messages src->dst).
    # Scatter once in f32, cast to bf16 once.
    adj = jnp.zeros((n_pad, n_pad), jnp.float32)
    adj = adj.at[edge_index[1], edge_index[0]].add(edge_weight)
    adj = adj.astype(jnp.bfloat16)
    # TODO(synk): exploit the per-graph block-diagonal structure of A (scalar
    # prefetch of per-tile column ranges / block mask) to skip all-zero A
    # tiles, and fuse all layers into one kernel so A streams from HBM once.

    # Fold bias + BatchNorm1d (inference stats) into weights / shift (f32 fold).
    w_roots, w_rels, shifts = [], [], []
    for li, layer in enumerate(params["layers"]):
        gamma, beta, mean, var = layer["bn"]
        s = gamma / jnp.sqrt(var + _BN_EPS)
        w_root = layer["w_root"] * s[None, :]
        w_rel = layer["w_rel"] * s[None, :]
        shift = (layer["bias"] - mean) * s + beta
        if li == 0:                                   # pad K -> k_pad rows
            w_root = jnp.pad(w_root, ((0, k_pad - in_dim), (0, 0)))
            w_rel = jnp.pad(w_rel, ((0, k_pad - in_dim), (0, 0)))
        w_roots.append(w_root.astype(jnp.bfloat16))
        w_rels.append(w_rel.astype(jnp.bfloat16))
        shifts.append(shift.reshape(1, -1).astype(jnp.float32))

    # Layer-0 rel projection: hr0 = x @ W_rel0' (later hr's come from the
    # previous layer's fused epilogue).
    h = x_p
    hr = rel_proj(x_p, w_rels[0], tn=tn)

    contrib = None
    for li in range(num_layers):
        last = li == num_layers - 1
        if last:
            w_next = params["fc_w"].astype(jnp.bfloat16)     # (hidden, 1)
            proj_dtype = jnp.float32
        else:
            w_next = w_rels[li + 1]
            proj_dtype = jnp.bfloat16
        outs = graphconv_layer(h, hr, adj, w_roots[li], shifts[li], w_next,
                               tn=tn, tc=tc, proj_dtype=proj_dtype,
                               write_h=not last)
        if last:
            contrib = outs            # (n_pad, 1) f32 per-node FC contribution
        else:
            h, hr = outs
        # TODO(synk): Dropout is identity in inference mode; training-mode
        # dropout masks and batch-statistics BatchNorm are not implemented.

    # global_mean_pool as a (g_pad, n_pad) mean-pooling matrix applied to the
    # per-node FC contributions: P @ (h @ fc_w) + b. Padded nodes excluded.
    g_pad = max(8, ((num_graphs + 7) // 8) * 8)
    node_graph = jnp.pad(batch, (0, n_pad - n_nodes), constant_values=-1)
    onehot = (node_graph[None, :] == jnp.arange(g_pad)[:, None]).astype(jnp.float32)
    counts = jnp.maximum(onehot.sum(axis=1, keepdims=True), 1.0)
    pool_mat = onehot / counts

    out = pool_fc(pool_mat, contrib, params["fc_b"])
    return out[:num_graphs]


# ----------------------------------------------------------------------------
# Parameters (deterministic synthetic init, shapes match the PyTorch module)
# ----------------------------------------------------------------------------
def init_params(key, input_dim, hidden_channels, num_layers):
    dims = [input_dim] + [hidden_channels] * num_layers
    layers = []
    for i in range(num_layers):
        k = jax.random.fold_in(key, i)
        kw1, kw2, kb, kg, kbe, km, kv = jax.random.split(k, 7)
        k_in, k_out = dims[i], dims[i + 1]
        layers.append({
            # torch GraphConv lin_root / lin_rel weights are (out, in); stored
            # pre-transposed as (in, out) for the kernel.
            "w_root": jax.random.normal(kw1, (k_in, k_out), jnp.float32)
                      / jnp.sqrt(k_in),
            "w_rel": jax.random.normal(kw2, (k_in, k_out), jnp.float32)
                     / jnp.sqrt(k_in),
            "bias": 0.01 * jax.random.normal(kb, (k_out,), jnp.float32),
            # BatchNorm1d inference stats: (gamma, beta, running_mean, running_var)
            "bn": (1.0 + 0.1 * jax.random.normal(kg, (k_out,), jnp.float32),
                   0.1 * jax.random.normal(kbe, (k_out,), jnp.float32),
                   0.1 * jax.random.normal(km, (k_out,), jnp.float32),
                   jax.random.uniform(kv, (k_out,), jnp.float32, minval=0.5,
                                      maxval=1.5)),
        })
    kf = jax.random.fold_in(key, num_layers)
    kfw, kfb = jax.random.split(kf)
    return {
        "layers": layers,
        "fc_w": jax.random.normal(kfw, (hidden_channels, 1), jnp.float32)
                / jnp.sqrt(hidden_channels),
        "fc_b": 0.01 * jax.random.normal(kfb, (1,), jnp.float32),
    }


if __name__ == "__main__":
    key = jax.random.PRNGKey(0)
    k_param, k_x, k_src, k_dst, k_w = jax.random.split(key, 5)

    input_dim, hidden_channels, num_layers = 16, 128, 3
    nodes_per_graph, num_graphs, edges_per_graph = 30, 2, 120
    n_nodes = nodes_per_graph * num_graphs

    params = init_params(k_param, input_dim, hidden_channels, num_layers)

    x = jax.random.normal(k_x, (n_nodes, input_dim), jnp.float32)
    src = jax.random.randint(k_src, (num_graphs, edges_per_graph), 0,
                             nodes_per_graph)
    dst = jax.random.randint(k_dst, (num_graphs, edges_per_graph), 0,
                             nodes_per_graph)
    offs = (jnp.arange(num_graphs) * nodes_per_graph)[:, None]
    edge_index = jnp.stack([(src + offs).reshape(-1),
                            (dst + offs).reshape(-1)], axis=0)
    edge_weight = jax.random.uniform(k_w, (edge_index.shape[1],), jnp.float32,
                                     minval=0.1, maxval=1.0)
    batch = jnp.repeat(jnp.arange(num_graphs), nodes_per_graph)

    tn, tc = _default_tiles()
    fwd = jax.jit(functools.partial(graph_regression_forward,
                                    num_graphs=num_graphs, tn=tn, tc=tc))
    y = fwd(params, x, edge_index, edge_weight, batch)
    y = jax.block_until_ready(y)

    assert y.shape == (num_graphs, 1), y.shape
    assert bool(jnp.all(jnp.isfinite(y)))
    print("KERNEL_OK")
</pallas_src>

<mosaic_0001>
module attributes {stable_mosaic.version = 11 : i64} {
  func.func private @main(%arg0: i32) attributes {dimension_semantics = [#tpu.dimension_semantics<core_parallel>], iteration_bounds = array<i64: 2>, tpu.core_type = #tpu.core_type<sc_scalar_subcore>, window_params = []} {
    return
  }
}

module attributes {stable_mosaic.version = 11 : i64} {
  func.func private @main(%arg0: i32) attributes {dimension_semantics = [#tpu.dimension_semantics<core_parallel>], iteration_bounds = array<i64: 2>, tpu.core_type = #tpu.core_type<sc_scalar_subcore>, window_params = []} {
    return
  }
}

module attributes {stable_mosaic.version = 11 : i64} {
  func.func @_rel_proj_kernel(%arg0: i32, %arg1: memref<256x128xbf16, #tpu.memory_space<vmem>>, %arg2: memref<128x128xbf16, #tpu.memory_space<vmem>>, %arg3: memref<256x128xbf16, #tpu.memory_space<vmem>>) attributes {dimension_semantics = [#tpu.dimension_semantics<parallel>], iteration_bounds = array<i64: 1>, scalar_prefetch = 0 : i64, scratch_operands = 0 : i64, tpu.core_type = #tpu.core_type<tc>, window_params = [{transform_indices = @transform_0, window_bounds = array<i64: 256, 128>}, {pipeline_mode = #tpu.pipeline_mode<synchronous>, transform_indices = @transform_1, window_bounds = array<i64: 128, 128>}, {transform_indices = @transform_2, window_bounds = array<i64: 256, 128>}]} {
    %c0 = arith.constant 0 : index
    %c0_0 = arith.constant 0 : index
    %0 = vector.load %arg1[%c0, %c0_0] : memref<256x128xbf16, #tpu.memory_space<vmem>>, vector<256x128xbf16>
    %c0_1 = arith.constant 0 : index
    %c0_2 = arith.constant 0 : index
    %1 = vector.load %arg2[%c0_1, %c0_2] : memref<128x128xbf16, #tpu.memory_space<vmem>>, vector<128x128xbf16>
    %cst = arith.constant dense<0.000000e+00> : vector<256x128xf32>
    %2 = tpu.matmul %0, %1, %cst {dimension_numbers = #tpu.dot_dimension_numbers<[1], [0], [0], [1], [0, 0, 1, 1], [], []>} : vector<256x128xbf16>, vector<128x128xbf16>, vector<256x128xf32> -> vector<256x128xf32>
    %3 = arith.truncf %2 : vector<256x128xf32> to vector<256x128xbf16>
    %c0_3 = arith.constant 0 : index
    %c0_4 = arith.constant 0 : index
    %4 = vector.load %arg3[%c0_3, %c0_4] : memref<256x128xbf16, #tpu.memory_space<vmem>>, vector<256x128xbf16>
    tpu.vector_store %arg3[%c0_3, %c0_4], %3 {strides = array<i32>} : memref<256x128xbf16, #tpu.memory_space<vmem>>, vector<256x128xbf16>,
    return
  }
  func.func @transform_0(%arg0: i32) -> (i32, i32) {
    %c0_i32 = arith.constant 0 : i32
    %c0_i32_0 = arith.constant 0 : i32
    return %arg0, %c0_i32 : i32, i32
  }
  func.func @transform_1(%arg0: i32) -> (i32, i32) {
    %c0_i32 = arith.constant 0 : i32
    %c0_i32_0 = arith.constant 0 : i32
    %c0_i32_1 = arith.constant 0 : i32
    return %c0_i32, %c0_i32_0 : i32, i32
  }
  func.func @transform_2(%arg0: i32) -> (i32, i32) {
    %c0_i32 = arith.constant 0 : i32
    %c0_i32_0 = arith.constant 0 : i32
    return %arg0, %c0_i32 : i32, i32
  }
}

module attributes {stable_mosaic.version = 11 : i64} {
  func.func @_layer_kernel(%arg0: i32, %arg1: i32, %arg2: memref<256x128xbf16, #tpu.memory_space<vmem>>, %arg3: memref<256x128xbf16, #tpu.memory_space<vmem>>, %arg4: memref<256x256xbf16, #tpu.memory_space<vmem>>, %arg5: memref<128x128xbf16, #tpu.memory_space<vmem>>, %arg6: memref<1x128xf32, #tpu.memory_space<vmem>>, %arg7: memref<128x1xbf16, #tpu.memory_space<vmem>>, %arg8: memref<256x1xf32, #tpu.memory_space<vmem>>, %arg9: memref<256x128xf32, #tpu.memory_space<vmem>>) attributes {dimension_semantics = [#tpu.dimension_semantics<parallel>, #tpu.dimension_semantics<arbitrary>], iteration_bounds = array<i64: 1, 1>, scalar_prefetch = 0 : i64, scratch_operands = 1 : i64, tpu.core_type = #tpu.core_type<tc>, window_params = [{transform_indices = @transform_0, window_bounds = array<i64: 256, 128>}, {transform_indices = @transform_1, window_bounds = array<i64: 256, 128>}, {transform_indices = @transform_2, window_bounds = array<i64: 256, 256>}, {pipeline_mode = #tpu.pipeline_mode<synchronous>, transform_indices = @transform_3, window_bounds = array<i64: 128, 128>}, {pipeline_mode = #tpu.pipeline_mode<synchronous>, transform_indices = @transform_4, window_bounds = array<i64: 1, 128>}, {pipeline_mode = #tpu.pipeline_mode<synchronous>, transform_indices = @transform_5, window_bounds = array<i64: 128, 1>}, {transform_indices = @transform_6, window_bounds = array<i64: 256, 1>}]} {
    %c0_i32 = arith.constant 0 : i32
    %0 = arith.cmpi eq, %arg1, %c0_i32 : i32
    %1 = arith.extui %0 : i1 to i32
    %c0_i32_0 = arith.constant 0 : i32
    %2 = arith.cmpi ne, %1, %c0_i32_0 : i32
    scf.if %2 {
      %c0_10 = arith.constant 0 : index
      %c0_11 = arith.constant 0 : index
      %12 = vector.load %arg2[%c0_10, %c0_11] : memref<256x128xbf16, #tpu.memory_space<vmem>>, vector<256x128xbf16>
      %c0_12 = arith.constant 0 : index
      %c0_13 = arith.constant 0 : index
      %13 = vector.load %arg5[%c0_12, %c0_13] : memref<128x128xbf16, #tpu.memory_space<vmem>>, vector<128x128xbf16>
      %cst_14 = arith.constant dense<0.000000e+00> : vector<256x128xf32>
      %14 = tpu.matmul %12, %13, %cst_14 {dimension_numbers = #tpu.dot_dimension_numbers<[1], [0], [0], [1], [0, 0, 1, 1], [], []>} : vector<256x128xbf16>, vector<128x128xbf16>, vector<256x128xf32> -> vector<256x128xf32>
      %c0_15 = arith.constant 0 : index
      %c0_16 = arith.constant 0 : index
      %15 = vector.load %arg9[%c0_15, %c0_16] : memref<256x128xf32, #tpu.memory_space<vmem>>, vector<256x128xf32>
      tpu.vector_store %arg9[%c0_15, %c0_16], %14 {strides = array<i32>} : memref<256x128xf32, #tpu.memory_space<vmem>>, vector<256x128xf32>,
    } else {
    }
    %c0 = arith.constant 0 : index
    %c0_1 = arith.constant 0 : index
    %3 = vector.load %arg9[%c0, %c0_1] : memref<256x128xf32, #tpu.memory_space<vmem>>, vector<256x128xf32>
    %c0_2 = arith.constant 0 : index
    %c0_3 = arith.constant 0 : index
    %4 = vector.load %arg4[%c0_2, %c0_3] : memref<256x256xbf16, #tpu.memory_space<vmem>>, vector<256x256xbf16>
    %c0_4 = arith.constant 0 : index
    %c0_5 = arith.constant 0 : index
    %5 = vector.load %arg3[%c0_4, %c0_5] : memref<256x128xbf16, #tpu.memory_space<vmem>>, vector<256x128xbf16>
    %cst = arith.constant dense<0.000000e+00> : vector<256x128xf32>
    %6 = tpu.matmul %4, %5, %cst {dimension_numbers = #tpu.dot_dimension_numbers<[1], [0], [0], [1], [0, 0, 1, 1], [], []>} : vector<256x256xbf16>, vector<256x128xbf16>, vector<256x128xf32> -> vector<256x128xf32>
    %7 = arith.addf %3, %6 : vector<256x128xf32>
    %c0_6 = arith.constant 0 : index
    %c0_7 = arith.constant 0 : index
    %8 = vector.load %arg9[%c0_6, %c0_7] : memref<256x128xf32, #tpu.memory_space<vmem>>, vector<256x128xf32>
    tpu.vector_store %arg9[%c0_6, %c0_7], %7 {strides = array<i32>} : memref<256x128xf32, #tpu.memory_space<vmem>>, vector<256x128xf32>,
    %c0_i32_8 = arith.constant 0 : i32
    %9 = arith.cmpi eq, %arg1, %c0_i32_8 : i32
    %10 = arith.extui %9 : i1 to i32
    %c0_i32_9 = arith.constant 0 : i32
    %11 = arith.cmpi ne, %10, %c0_i32_9 : i32
    scf.if %11 {
      %c0_10 = arith.constant 0 : index
      %c0_11 = arith.constant 0 : index
      %12 = vector.load %arg9[%c0_10, %c0_11] : memref<256x128xf32, #tpu.memory_space<vmem>>, vector<256x128xf32>
      %c0_12 = arith.constant 0 : index
      %c0_13 = arith.constant 0 : index
      %13 = vector.load %arg6[%c0_12, %c0_13] : memref<1x128xf32, #tpu.memory_space<vmem>>, vector<1x128xf32>
      %14 = vector.broadcast %13 : vector<1x128xf32> to vector<256x128xf32>
      %15 = arith.addf %12, %14 : vector<256x128xf32>
      %cst_14 = arith.constant 0.000000e+00 : f32
      %16 = vector.broadcast %cst_14 : f32 to vector<256x128xf32>
      %17 = arith.maximumf %15, %16 : vector<256x128xf32>
      %18 = arith.truncf %17 : vector<256x128xf32> to vector<256x128xbf16>
      %c0_15 = arith.constant 0 : index
      %c0_16 = arith.constant 0 : index
      %19 = vector.load %arg7[%c0_15, %c0_16] : memref<128x1xbf16, #tpu.memory_space<vmem>>, vector<128x1xbf16>
      %cst_17 = arith.constant dense<0.000000e+00> : vector<256x1xf32>
      %20 = tpu.matmul %18, %19, %cst_17 {dimension_numbers = #tpu.dot_dimension_numbers<[1], [0], [0], [1], [0, 0, 1, 1], [], []>} : vector<256x128xbf16>, vector<128x1xbf16>, vector<256x1xf32> -> vector<256x1xf32>
      %c0_18 = arith.constant 0 : index
      %c0_19 = arith.constant 0 : index
      %21 = vector.load %arg8[%c0_18, %c0_19] : memref<256x1xf32, #tpu.memory_space<vmem>>, vector<256x1xf32>
      tpu.vector_store %arg8[%c0_18, %c0_19], %20 {strides = array<i32>} : memref<256x1xf32, #tpu.memory_space<vmem>>, vector<256x1xf32>,
    } else {
    }
    return
  }
  func.func @transform_0(%arg0: i32, %arg1: i32) -> (i32, i32) {
    %c0_i32 = arith.constant 0 : i32
    %c0_i32_0 = arith.constant 0 : i32
    return %arg0, %c0_i32 : i32, i32
  }
  func.func @transform_1(%arg0: i32, %arg1: i32) -> (i32, i32) {
    %c0_i32 = arith.constant 0 : i32
    %c0_i32_0 = arith.constant 0 : i32
    return %arg1, %c0_i32 : i32, i32
  }
  func.func @transform_2(%arg0: i32, %arg1: i32) -> (i32, i32) {
    %c0_i32 = arith.constant 0 : i32
    return %arg0, %arg1 : i32, i32
  }
  func.func @transform_3(%arg0: i32, %arg1: i32) -> (i32, i32) {
    %c0_i32 = arith.constant 0 : i32
    %c0_i32_0 = arith.constant 0 : i32
    %c0_i32_1 = arith.constant 0 : i32
    return %c0_i32, %c0_i32_0 : i32, i32
  }
  func.func @transform_4(%arg0: i32, %arg1: i32) -> (i32, i32) {
    %c0_i32 = arith.constant 0 : i32
    %c0_i32_0 = arith.constant 0 : i32
    %c0_i32_1 = arith.constant 0 : i32
    return %c0_i32, %c0_i32_0 : i32, i32
  }
  func.func @transform_5(%arg0: i32, %arg1: i32) -> (i32, i32) {
    %c0_i32 = arith.constant 0 : i32
    %c0_i32_0 = arith.constant 0 : i32
    %c0_i32_1 = arith.constant 0 : i32
    return %c0_i32, %c0_i32_0 : i32, i32
  }
  func.func @transform_6(%arg0: i32, %arg1: i32) -> (i32, i32) {
    %c0_i32 = arith.constant 0 : i32
    %c0_i32_0 = arith.constant 0 : i32
    return %arg0, %c0_i32 : i32, i32
  }
}

module attributes {stable_mosaic.version = 11 : i64} {
  func.func @_layer_kernel(%arg0: i32, %arg1: i32, %arg2: memref<256x128xbf16, #tpu.memory_space<vmem>>, %arg3: memref<256x128xbf16, #tpu.memory_space<vmem>>, %arg4: memref<256x256xbf16, #tpu.memory_space<vmem>>, %arg5: memref<128x128xbf16, #tpu.memory_space<vmem>>, %arg6: memref<1x128xf32, #tpu.memory_space<vmem>>, %arg7: memref<128x128xbf16, #tpu.memory_space<vmem>>, %arg8: memref<256x128xbf16, #tpu.memory_space<vmem>>, %arg9: memref<256x128xbf16, #tpu.memory_space<vmem>>, %arg10: memref<256x128xf32, #tpu.memory_space<vmem>>) attributes {dimension_semantics = [#tpu.dimension_semantics<parallel>, #tpu.dimension_semantics<arbitrary>], iteration_bounds = array<i64: 1, 1>, scalar_prefetch = 0 : i64, scratch_operands = 1 : i64, tpu.core_type = #tpu.core_type<tc>, window_params = [{transform_indices = @transform_0, window_bounds = array<i64: 256, 128>}, {transform_indices = @transform_1, window_bounds = array<i64: 256, 128>}, {transform_indices = @transform_2, window_bounds = array<i64: 256, 256>}, {pipeline_mode = #tpu.pipeline_mode<synchronous>, transform_indices = @transform_3, window_bounds = array<i64: 128, 128>}, {pipeline_mode = #tpu.pipeline_mode<synchronous>, transform_indices = @transform_4, window_bounds = array<i64: 1, 128>}, {pipeline_mode = #tpu.pipeline_mode<synchronous>, transform_indices = @transform_5, window_bounds = array<i64: 128, 128>}, {transform_indices = @transform_6, window_bounds = array<i64: 256, 128>}, {transform_indices = @transform_7, window_bounds = array<i64: 256, 128>}]} {
    %c0_i32 = arith.constant 0 : i32
    %0 = arith.cmpi eq, %arg1, %c0_i32 : i32
    %1 = arith.extui %0 : i1 to i32
    %c0_i32_0 = arith.constant 0 : i32
    %2 = arith.cmpi ne, %1, %c0_i32_0 : i32
    scf.if %2 {
      %c0_10 = arith.constant 0 : index
      %c0_11 = arith.constant 0 : index
      %12 = vector.load %arg2[%c0_10, %c0_11] : memref<256x128xbf16, #tpu.memory_space<vmem>>, vector<256x128xbf16>
      %c0_12 = arith.constant 0 : index
      %c0_13 = arith.constant 0 : index
      %13 = vector.load %arg5[%c0_12, %c0_13] : memref<128x128xbf16, #tpu.memory_space<vmem>>, vector<128x128xbf16>
      %cst_14 = arith.constant dense<0.000000e+00> : vector<256x128xf32>
      %14 = tpu.matmul %12, %13, %cst_14 {dimension_numbers = #tpu.dot_dimension_numbers<[1], [0], [0], [1], [0, 0, 1, 1], [], []>} : vector<256x128xbf16>, vector<128x128xbf16>, vector<256x128xf32> -> vector<256x128xf32>
      %c0_15 = arith.constant 0 : index
      %c0_16 = arith.constant 0 : index
      %15 = vector.load %arg10[%c0_15, %c0_16] : memref<256x128xf32, #tpu.memory_space<vmem>>, vector<256x128xf32>
      tpu.vector_store %arg10[%c0_15, %c0_16], %14 {strides = array<i32>} : memref<256x128xf32, #tpu.memory_space<vmem>>, vector<256x128xf32>,
    } else {
    }
    %c0 = arith.constant 0 : index
    %c0_1 = arith.constant 0 : index
    %3 = vector.load %arg10[%c0, %c0_1] : memref<256x128xf32, #tpu.memory_space<vmem>>, vector<256x128xf32>
    %c0_2 = arith.constant 0 : index
    %c0_3 = arith.constant 0 : index
    %4 = vector.load %arg4[%c0_2, %c0_3] : memref<256x256xbf16, #tpu.memory_space<vmem>>, vector<256x256xbf16>
    %c0_4 = arith.constant 0 : index
    %c0_5 = arith.constant 0 : index
    %5 = vector.load %arg3[%c0_4, %c0_5] : memref<256x128xbf16, #tpu.memory_space<vmem>>, vector<256x128xbf16>
    %cst = arith.constant dense<0.000000e+00> : vector<256x128xf32>
    %6 = tpu.matmul %4, %5, %cst {dimension_numbers = #tpu.dot_dimension_numbers<[1], [0], [0], [1], [0, 0, 1, 1], [], []>} : vector<256x256xbf16>, vector<256x128xbf16>, vector<256x128xf32> -> vector<256x128xf32>
    %7 = arith.addf %3, %6 : vector<256x128xf32>
    %c0_6 = arith.constant 0 : index
    %c0_7 = arith.constant 0 : index
    %8 = vector.load %arg10[%c0_6, %c0_7] : memref<256x128xf32, #tpu.memory_space<vmem>>, vector<256x128xf32>
    tpu.vector_store %arg10[%c0_6, %c0_7], %7 {strides = array<i32>} : memref<256x128xf32, #tpu.memory_space<vmem>>, vector<256x128xf32>,
    %c0_i32_8 = arith.constant 0 : i32
    %9 = arith.cmpi eq, %arg1, %c0_i32_8 : i32
    %10 = arith.extui %9 : i1 to i32
    %c0_i32_9 = arith.constant 0 : i32
    %11 = arith.cmpi ne, %10, %c0_i32_9 : i32
    scf.if %11 {
      %c0_10 = arith.constant 0 : index
      %c0_11 = arith.constant 0 : index
      %12 = vector.load %arg10[%c0_10, %c0_11] : memref<256x128xf32, #tpu.memory_space<vmem>>, vector<256x128xf32>
      %c0_12 = arith.constant 0 : index
      %c0_13 = arith.constant 0 : index
      %13 = vector.load %arg6[%c0_12, %c0_13] : memref<1x128xf32, #tpu.memory_space<vmem>>, vector<1x128xf32>
      %14 = vector.broadcast %13 : vector<1x128xf32> to vector<256x128xf32>
      %15 = arith.addf %12, %14 : vector<256x128xf32>
      %cst_14 = arith.constant 0.000000e+00 : f32
      %16 = vector.broadcast %cst_14 : f32 to vector<256x128xf32>
      %17 = arith.maximumf %15, %16 : vector<256x128xf32>
      %18 = arith.truncf %17 : vector<256x128xf32> to vector<256x128xbf16>
      %c0_15 = arith.constant 0 : index
      %c0_16 = arith.constant 0 : index
      %19 = vector.load %arg8[%c0_15, %c0_16] : memref<256x128xbf16, #tpu.memory_space<vmem>>, vector<256x128xbf16>
      tpu.vector_store %arg8[%c0_15, %c0_16], %18 {strides = array<i32>} : memref<256x128xbf16, #tpu.memory_space<vmem>>, vector<256x128xbf16>,
      %c0_17 = arith.constant 0 : index
      %c0_18 = arith.constant 0 : index
      %20 = vector.load %arg7[%c0_17, %c0_18] : memref<128x128xbf16, #tpu.memory_space<vmem>>, vector<128x128xbf16>
      %cst_19 = arith.constant dense<0.000000e+00> : vector<256x128xf32>
      %21 = tpu.matmul %18, %20, %cst_19 {dimension_numbers = #tpu.dot_dimension_numbers<[1], [0], [0], [1], [0, 0, 1, 1], [], []>} : vector<256x128xbf16>, vector<128x128xbf16>, vector<256x128xf32> -> vector<256x128xf32>
      %22 = arith.truncf %21 : vector<256x128xf32> to vector<256x128xbf16>
      %c0_20 = arith.constant 0 : index
      %c0_21 = arith.constant 0 : index
      %23 = vector.load %arg9[%c0_20, %c0_21] : memref<256x128xbf16, #tpu.memory_space<vmem>>, vector<256x128xbf16>
      tpu.vector_store %arg9[%c0_20, %c0_21], %22 {strides = array<i32>} : memref<256x128xbf16, #tpu.memory_space<vmem>>, vector<256x128xbf16>,
    } else {
    }
    return
  }
  func.func @transform_0(%arg0: i32, %arg1: i32) -> (i32, i32) {
    %c0_i32 = arith.constant 0 : i32
    %c0_i32_0 = arith.constant 0 : i32
    return %arg0, %c0_i32 : i32, i32
  }
  func.func @transform_1(%arg0: i32, %arg1: i32) -> (i32, i32) {
    %c0_i32 = arith.constant 0 : i32
    %c0_i32_0 = arith.constant 0 : i32
    return %arg1, %c0_i32 : i32, i32
  }
  func.func @transform_2(%arg0: i32, %arg1: i32) -> (i32, i32) {
    %c0_i32 = arith.constant 0 : i32
    return %arg0, %arg1 : i32, i32
  }
  func.func @transform_3(%arg0: i32, %arg1: i32) -> (i32, i32) {
    %c0_i32 = arith.constant 0 : i32
    %c0_i32_0 = arith.constant 0 : i32
    %c0_i32_1 = arith.constant 0 : i32
    return %c0_i32, %c0_i32_0 : i32, i32
  }
  func.func @transform_4(%arg0: i32, %arg1: i32) -> (i32, i32) {
    %c0_i32 = arith.constant 0 : i32
    %c0_i32_0 = arith.constant 0 : i32
    %c0_i32_1 = arith.constant 0 : i32
    return %c0_i32, %c0_i32_0 : i32, i32
  }
  func.func @transform_5(%arg0: i32, %arg1: i32) -> (i32, i32) {
    %c0_i32 = arith.constant 0 : i32
    %c0_i32_0 = arith.constant 0 : i32
    %c0_i32_1 = arith.constant 0 : i32
    return %c0_i32, %c0_i32_0 : i32, i32
  }
  func.func @transform_6(%arg0: i32, %arg1: i32) -> (i32, i32) {
    %c0_i32 = arith.constant 0 : i32
    %c0_i32_0 = arith.constant 0 : i32
    return %arg0, %c0_i32 : i32, i32
  }
  func.func @transform_7(%arg0: i32, %arg1: i32) -> (i32, i32) {
    %c0_i32 = arith.constant 0 : i32
    %c0_i32_0 = arith.constant 0 : i32
    return %arg0, %c0_i32 : i32, i32
  }
}

module attributes {stable_mosaic.version = 11 : i64} {
  func.func @_pool_fc_kernel(%arg0: i32, %arg1: memref<8x256xf32, #tpu.memory_space<vmem>>, %arg2: memref<256x1xf32, #tpu.memory_space<vmem>>, %arg3: memref<1x1xf32, #tpu.memory_space<vmem>>, %arg4: memref<8x1xf32, #tpu.memory_space<vmem>>) attributes {dimension_semantics = [#tpu.dimension_semantics<arbitrary>], iteration_bounds = array<i64: 1>, scalar_prefetch = 0 : i64, scratch_operands = 0 : i64, tpu.core_type = #tpu.core_type<tc>, window_params = [{pipeline_mode = #tpu.pipeline_mode<synchronous>, transform_indices = @transform_0, window_bounds = array<i64: 8, 256>}, {pipeline_mode = #tpu.pipeline_mode<synchronous>, transform_indices = @transform_1, window_bounds = array<i64: 256, 1>}, {pipeline_mode = #tpu.pipeline_mode<synchronous>, transform_indices = @transform_2, window_bounds = array<i64: 1, 1>}, {pipeline_mode = #tpu.pipeline_mode<synchronous>, transform_indices = @transform_3, window_bounds = array<i64: 8, 1>}]} {
    %c0 = arith.constant 0 : index
    %c0_0 = arith.constant 0 : index
    %0 = vector.load %arg1[%c0, %c0_0] : memref<8x256xf32, #tpu.memory_space<vmem>>, vector<8x256xf32>
    %c0_1 = arith.constant 0 : index
    %c0_2 = arith.constant 0 : index
    %1 = vector.load %arg2[%c0_1, %c0_2] : memref<256x1xf32, #tpu.memory_space<vmem>>, vector<256x1xf32>
    %cst = arith.constant dense<0.000000e+00> : vector<8x1xf32>
    %2 = tpu.matmul %0, %1, %cst {dimension_numbers = #tpu.dot_dimension_numbers<[1], [0], [0], [1], [0, 0, 1, 1], [], []>} : vector<8x256xf32>, vector<256x1xf32>, vector<8x1xf32> -> vector<8x1xf32>
    %c0_3 = arith.constant 0 : index
    %c0_4 = arith.constant 0 : index
    %3 = vector.load %arg3[%c0_3, %c0_4] : memref<1x1xf32, #tpu.memory_space<vmem>>, vector<1x1xf32>
    %4 = vector.broadcast %3 : vector<1x1xf32> to vector<8x1xf32>
    %5 = arith.addf %2, %4 : vector<8x1xf32>
    %c0_5 = arith.constant 0 : index
    %c0_6 = arith.constant 0 : index
    %6 = vector.load %arg4[%c0_5, %c0_6] : memref<8x1xf32, #tpu.memory_space<vmem>>, vector<8x1xf32>
    tpu.vector_store %arg4[%c0_5, %c0_6], %5 {strides = array<i32>} : memref<8x1xf32, #tpu.memory_space<vmem>>, vector<8x1xf32>,
    return
  }
  func.func @transform_0(%arg0: i32) -> (i32, i32) {
    %c0_i32 = arith.constant 0 : i32
    %c0_i32_0 = arith.constant 0 : i32
    %c0_i32_1 = arith.constant 0 : i32
    return %c0_i32, %c0_i32_0 : i32, i32
  }
  func.func @transform_1(%arg0: i32) -> (i32, i32) {
    %c0_i32 = arith.constant 0 : i32
    %c0_i32_0 = arith.constant 0 : i32
    %c0_i32_1 = arith.constant 0 : i32
    return %c0_i32, %c0_i32_0 : i32, i32
  }
  func.func @transform_2(%arg0: i32) -> (i32, i32) {
    %c0_i32 = arith.constant 0 : i32
    %c0_i32_0 = arith.constant 0 : i32
    %c0_i32_1 = arith.constant 0 : i32
    return %c0_i32, %c0_i32_0 : i32, i32
  }
  func.func @transform_3(%arg0: i32) -> (i32, i32) {
    %c0_i32 = arith.constant 0 : i32
    %c0_i32_0 = arith.constant 0 : i32
    %c0_i32_1 = arith.constant 0 : i32
    return %c0_i32, %c0_i32_0 : i32, i32
  }
}

</mosaic_0001>

<bundles_post_ra>
// kernel: graph_regression_forward.5
= control target key start
LH: loop header
LB: loop body
LE: loop exit
PB: predicated region body
PF: predicated region fallthrough
CT: control target
= control target key end

     0   :  { %s959_s1 = inlined_call_operand.vmem [shape: bf16[128,128], index: 1, kind: input, shape index: {}]   ;;  %s960_s0 = inlined_call_operand.vmem [shape: bf16[256,128], index: 0, kind: input, shape index: {}]   ;;  %s961_s2 = inlined_call_operand.vmem [shape: bf16[256,128], index: 2, kind: output, shape index: {}]  }
   0x1   :  { %v800_v0 = vld [vmem:[%s959_s1] sm:$0xff]   ;;  %v801_v1 = vld [vmem:[%s959_s1 + $0x8] sm:$0xff]   ;;  %v802_v2 = vld [vmem:[%s959_s1 + $0x10] sm:$0xff]  }
   0x2   :  { %736 = vmatprep.subr.bf16.mxu0 %v800_v0  ;;  %784 = vmatprep.subr.bf16.mxu1 %v800_v0  ;;  %v803_v3 = vld [vmem:[%s959_s1 + $0x18] sm:$0xff]   ;;  %v808_v4 = vld [vmem:[%s960_s0] sm:$0xff]   ;;  %v805_v7 = vld [vmem:[%s959_s1 + $0x28] sm:$0xff]  }
   0x3   :  { %737 = vmatpush3.bf16.msra.mxu0 %v800_v0  ;;  %792 = vmatpush3.bf16.msra.mxu1 %v800_v0  ;;  %v809_v5 = vld [vmem:[%s960_s0 + $0x40] sm:$0xff]   ;;  %v806_v8 = vld [vmem:[%s959_s1 + $0x30] sm:$0xff]   ;;  %v807_v9 = vld [vmem:[%s959_s1 + $0x38] sm:$0xff]  }
   0x4   :  { %738 = vmatprep.subr.bf16.mxu0 %v801_v1  ;;  %785 = vmatprep.subr.bf16.mxu1 %v801_v1  ;;  %v804_v6 = vld [vmem:[%s959_s1 + $0x20] sm:$0xff]   ;;  %v810_v10 = vld [vmem:[%s960_s0 + $0x8] sm:$0xff]   ;;  %v812_v12 = vld [vmem:[%s960_s0 + $0x10] sm:$0xff]  }
   0x5   :  { %752 = vmatprep.mubr.bf16.mxu0 %v808_v4  ;;  %768 = vmatprep.mubr.bf16.mxu1 %v809_v5  ;;  %v811_v11 = vld [vmem:[%s960_s0 + $0x48] sm:$0xff]   ;;  %v813_v13 = vld [vmem:[%s960_s0 + $0x50] sm:$0xff]   ;;  %v814_v14 = vld [vmem:[%s960_s0 + $0x18] sm:$0xff]  }
   0x6   :  { %v815_v15 = vld [vmem:[%s960_s0 + $0x58] sm:$0xff]   ;;  %v816_v16 = vld [vmem:[%s960_s0 + $0x20] sm:$0xff]   ;;  %v818_v18 = vld [vmem:[%s960_s0 + $0x28] sm:$0xff]  }
   0x7   :  { %739 = vmatpush3.bf16.msra.mxu0 %v801_v1  ;;  %793 = vmatpush3.bf16.msra.mxu1 %v801_v1  ;;  %v817_v17 = vld [vmem:[%s960_s0 + $0x60] sm:$0xff]   ;;  %v819_v19 = vld [vmem:[%s960_s0 + $0x68] sm:$0xff]   ;;  %v820_v20 = vld [vmem:[%s960_s0 + $0x30] sm:$0xff]  }
   0x8   :  { %740 = vmatprep.subr.bf16.mxu0 %v802_v2  ;;  %786 = vmatprep.subr.bf16.mxu1 %v802_v2  ;;  %v821_v21 = vld [vmem:[%s960_s0 + $0x70] sm:$0xff]   ;;  %v822_v22 = vld [vmem:[%s960_s0 + $0x38] sm:$0xff]  }
   0x9   :  { %v823_v23 = vld [vmem:[%s960_s0 + $0x78] sm:$0xff]  }
   0xb   :  { %741 = vmatpush3.bf16.msra.mxu0 %v802_v2  ;;  %794 = vmatpush3.bf16.msra.mxu1 %v802_v2 }
   0xc   :  { %742 = vmatprep.subr.bf16.mxu0 %v803_v3  ;;  %787 = vmatprep.subr.bf16.mxu1 %v803_v3 }
   0xf   :  { %743 = vmatpush3.bf16.msra.mxu0 %v803_v3  ;;  %795 = vmatpush3.bf16.msra.mxu1 %v803_v3 }
  0x10   :  { %744 = vmatprep.subr.bf16.mxu0 %v804_v6  ;;  %788 = vmatprep.subr.bf16.mxu1 %v804_v6 }
  0x13   :  { %745 = vmatpush3.bf16.msra.mxu0 %v804_v6  ;;  %796 = vmatpush3.bf16.msra.mxu1 %v804_v6 }
  0x14   :  { %746 = vmatprep.subr.bf16.mxu0 %v805_v7  ;;  %789 = vmatprep.subr.bf16.mxu1 %v805_v7 }
  0x17   :  { %747 = vmatpush3.bf16.msra.mxu0 %v805_v7  ;;  %797 = vmatpush3.bf16.msra.mxu1 %v805_v7 }
  0x18   :  { %748 = vmatprep.subr.bf16.mxu0 %v806_v8  ;;  %790 = vmatprep.subr.bf16.mxu1 %v806_v8 }
  0x1b   :  { %749 = vmatpush3.bf16.msra.mxu0 %v806_v8  ;;  %798 = vmatpush3.bf16.msra.mxu1 %v806_v8 }
  0x1c   :  { %750 = vmatprep.subr.bf16.mxu0 %v807_v9  ;;  %791 = vmatprep.subr.bf16.mxu1 %v807_v9 }
  0x1f   :  { %751 = vmatpush3.bf16.msra.mxu0 %v807_v9  ;;  %799 = vmatpush3.bf16.msra.mxu1 %v807_v9 }
  0x22   :  { %753 = vmatmul.mubr.bf16.vlgmr.msra.gmra.mrb[0].mxu0 %v810_v10  ;;  %769 = vmatmul.mubr.bf16.vlgmr.msra.gmra.mrb[0].mxu1 %v811_v11 }
  0x23   :  { %756 = vmatprep.mubr.bf16.mxu0 %v812_v12  ;;  %772 = vmatprep.mubr.bf16.mxu1 %v813_v13 }
  0x2a   :  { %757 = vmatmul.mubr.bf16.gmra.mrb[4].mxu0 %v814_v14  ;;  %773 = vmatmul.mubr.bf16.gmra.mrb[4].mxu1 %v815_v15 }
  0x2b   :  { %760 = vmatprep.mubr.bf16.mxu0 %v816_v16  ;;  %776 = vmatprep.mubr.bf16.mxu1 %v817_v17 }
  0x32   :  { %761 = vmatmul.mubr.bf16.gmra.mrb[8].mxu0 %v818_v18  ;;  %777 = vmatmul.mubr.bf16.gmra.mrb[8].mxu1 %v819_v19 }
  0x33   :  { %764 = vmatprep.mubr.bf16.mxu0 %v820_v20  ;;  %780 = vmatprep.mubr.bf16.mxu1 %v821_v21 }
  0x3a   :  { %765 = vmatmul.mubr.bf16.gmra.mrb[12].mxu0 %v822_v22  ;;  %781 = vmatmul.mubr.bf16.gmra.mrb[12].mxu1 %v823_v23 }
  0xf5   :  { %v754_v24 = vpop.f32.mrb[0].mxu0  ;;  %v770_v25 = vpop.f32.mrb[0].mxu1 }
  0xf6   :  { %v238_v26 = vpop.f32.mrb[1].mxu0  ;;  %v302_v27 = vpop.f32.mrb[1].mxu1 }
  0xf7   :  { %v755_v28 = vpop.f32.mrb[2].mxu0  ;;  %v771_v29 = vpop.f32.mrb[2].mxu1 }
  0xf8   :  { %v625_v30 = vpack.c.bf16 %v755_v28, %v754_v24  ;;  %v665_v31 = vpack.c.bf16 %v771_v29, %v770_v25  ;;  %v241_v32 = vpop.f32.mrb[3].mxu0  ;;  %v305_v33 = vpop.f32.mrb[3].mxu1 }
  0xf9   :  { %v620_v34 = vpack.c.bf16 %v241_v32, %v238_v26  ;;  %v660_v35 = vpack.c.bf16 %v305_v33, %v302_v27 }
  0xfa   :  { %697 = vst [vmem:[%s961_s2 + $0x8] sm:$0xff] %v625_v30   ;;  %705 = vst [vmem:[%s961_s2 + $0x48] sm:$0xff] %v665_v31  }
  0xfb   :  { %621 = vst [vmem:[%s961_s2] sm:$0xff] %v620_v34   ;;  %704 = vst [vmem:[%s961_s2 + $0x40] sm:$0xff] %v660_v35  }
  0xfd   :  { %v758_v36 = vpop.f32.mrb[4].mxu0  ;;  %v774_v37 = vpop.f32.mrb[4].mxu1 }
  0xfe   :  { %v254_v38 = vpop.f32.mrb[5].mxu0  ;;  %v318_v39 = vpop.f32.mrb[5].mxu1 }
  0xff   :  { %v759_v40 = vpop.f32.mrb[6].mxu0  ;;  %v775_v41 = vpop.f32.mrb[6].mxu1 }
 0x100   :  { %v635_v42 = vpack.c.bf16 %v759_v40, %v758_v36  ;;  %v675_v43 = vpack.c.bf16 %v775_v41, %v774_v37  ;;  %v257_v44 = vpop.f32.mrb[7].mxu0  ;;  %v321_v45 = vpop.f32.mrb[7].mxu1 }
 0x101   :  { %v630_v46 = vpack.c.bf16 %v257_v44, %v254_v38  ;;  %v670_v47 = vpack.c.bf16 %v321_v45, %v318_v39 }
 0x102   :  { %699 = vst [vmem:[%s961_s2 + $0x18] sm:$0xff] %v635_v42   ;;  %707 = vst [vmem:[%s961_s2 + $0x58] sm:$0xff] %v675_v43  }
 0x103   :  { %698 = vst [vmem:[%s961_s2 + $0x10] sm:$0xff] %v630_v46   ;;  %706 = vst [vmem:[%s961_s2 + $0x50] sm:$0xff] %v670_v47  }
 0x105   :  { %v762_v48 = vpop.f32.mrb[8].mxu0  ;;  %v778_v49 = vpop.f32.mrb[8].mxu1 }
 0x106   :  { %v270_v50 = vpop.f32.mrb[9].mxu0  ;;  %v334_v51 = vpop.f32.mrb[9].mxu1 }
 0x107   :  { %v763_v52 = vpop.f32.mrb[10].mxu0  ;;  %v779_v53 = vpop.f32.mrb[10].mxu1 }
 0x108   :  { %v645_v54 = vpack.c.bf16 %v763_v52, %v762_v48  ;;  %v685_v55 = vpack.c.bf16 %v779_v53, %v778_v49  ;;  %v273_v56 = vpop.f32.mrb[11].mxu0  ;;  %v337_v57 = vpop.f32.mrb[11].mxu1 }
 0x109   :  { %v640_v58 = vpack.c.bf16 %v273_v56, %v270_v50  ;;  %v680_v59 = vpack.c.bf16 %v337_v57, %v334_v51 }
 0x10a   :  { %701 = vst [vmem:[%s961_s2 + $0x28] sm:$0xff] %v645_v54   ;;  %709 = vst [vmem:[%s961_s2 + $0x68] sm:$0xff] %v685_v55  }
 0x10b   :  { %700 = vst [vmem:[%s961_s2 + $0x20] sm:$0xff] %v640_v58   ;;  %708 = vst [vmem:[%s961_s2 + $0x60] sm:$0xff] %v680_v59  }
 0x10d   :  { %v766_v60 = vpop.f32.mrb[12].mxu0  ;;  %v782_v61 = vpop.f32.mrb[12].mxu1 }
 0x10e   :  { %v286_v62 = vpop.f32.mrb[13].mxu0  ;;  %v350_v63 = vpop.f32.mrb[13].mxu1 }
 0x10f   :  { %v767_v0 = vpop.f32.mrb[14].mxu0  ;;  %v783_v1 = vpop.f32.mrb[14].mxu1 }
 0x110   :  { %v655_v2 = vpack.c.bf16 %v767_v0, %v766_v60  ;;  %v695_v3 = vpack.c.bf16 %v783_v1, %v782_v61  ;;  %v289_v4 = vpop.f32.mrb[15].mxu0  ;;  %v353_v5 = vpop.f32.mrb[15].mxu1 }
 0x111   :  { %v650_v6 = vpack.c.bf16 %v289_v4, %v286_v62  ;;  %v690_v7 = vpack.c.bf16 %v353_v5, %v350_v63 }
 0x112   :  { %703 = vst [vmem:[%s961_s2 + $0x38] sm:$0xff] %v655_v2   ;;  %711 = vst [vmem:[%s961_s2 + $0x78] sm:$0xff] %v695_v3  }
 0x113   :  { %702 = vst [vmem:[%s961_s2 + $0x30] sm:$0xff] %v650_v6   ;;  %710 = vst [vmem:[%s961_s2 + $0x70] sm:$0xff] %v690_v7  }

// kernel: graph_regression_forward.8
= control target key start
LH: loop header
LB: loop body
LE: loop exit
PB: predicated region body
PF: predicated region fallthrough
CT: control target
= control target key end

     0   :  { %vm1337_vm0 = vcmask 7168   ;;  %s2301_s1 = inlined_call_operand.vmem [shape: bf16[256,128], index: 1, kind: input, shape index: {}]   ;;  %s2302_s3 = inlined_call_operand.vmem [shape: bf16[128,128], index: 3, kind: input, shape index: {}]   ;;  %s2303_s2 = inlined_call_operand.vmem [shape: bf16[256,256], index: 2, kind: input, shape index: {}]   ;;  %s2304_s0 = inlined_call_operand.vmem [shape: bf16[256,128], index: 0, kind: input, shape index: {}]   ;;  %s2305_s5 = inlined_call_operand.vmem [shape: bf16[128,1], index: 5, kind: input, shape index: {}]   ;;  %s2306_s4 = inlined_call_operand.vmem [shape: f32[1,128], index: 4, kind: input, shape index: {}]   ;;  %s2307_s6 = inlined_call_operand.vmem [shape: f32[256,1], index: 6, kind: output, shape index: {}]  }
   0x1   :  { %v1711_v0 = vld [vmem:[%s2301_s1 + $0x40] sm:$0xff]   ;;  %v1714_v3 = vld [vmem:[%s2301_s1 + $0x48] sm:$0xff]   ;;  %v1717_v6 = vld [vmem:[%s2301_s1 + $0x50] sm:$0xff]  }
   0x2   :  { %v1712_v1 = vld [vmem:[%s2301_s1] sm:$0xff]   ;;  %1479 = vmatprep.subr.bf16.mxu1 %v1711_v0  ;;  %v1715_v4 = vld [vmem:[%s2301_s1 + $0x8] sm:$0xff]   ;;  %v1718_v7 = vld [vmem:[%s2301_s1 + $0x10] sm:$0xff]  }
   0x3   :  { %v1713_v2 = vld [vmem:[%s2302_s3] sm:$0xff]   ;;  %1480 = vmatpush3.bf16.msra.mxu1 %v1712_v1  ;;  %v1716_v5 = vld [vmem:[%s2302_s3 + $0x8] sm:$0xff]   ;;  %v1719_v8 = vld [vmem:[%s2302_s3 + $0x10] sm:$0xff]  }
   0x4   :  { %1615 = vmatprep.subr.bf16.mxu0 %v1713_v2  ;;  %1481 = vmatprep.subr.bf16.mxu1 %v1714_v3  ;;  %v1720_v9 = vld [vmem:[%s2301_s1 + $0x58] sm:$0xff]   ;;  %v1723_v12 = vld [vmem:[%s2301_s1 + $0x60] sm:$0xff]   ;;  %v1726_v15 = vld [vmem:[%s2301_s1 + $0x68] sm:$0xff]  }
   0x5   :  { %1616 = vmatpush3.bf16.msra.mxu0 %v1713_v2  ;;  %v1721_v10 = vld [vmem:[%s2301_s1 + $0x18] sm:$0xff]   ;;  %v1725_v13 = vld [vmem:[%s2302_s3 + $0x20] sm:$0xff]   ;;  %v1728_v16 = vld [vmem:[%s2302_s3 + $0x28] sm:$0xff]  }
   0x6   :  { %1617 = vmatprep.subr.bf16.mxu0 %v1716_v5  ;;  %v1722_v11 = vld [vmem:[%s2302_s3 + $0x18] sm:$0xff]   ;;  %v1724_v14 = vld [vmem:[%s2301_s1 + $0x20] sm:$0xff]   ;;  %v1727_v17 = vld [vmem:[%s2301_s1 + $0x28] sm:$0xff]  }
   0x7   :  { %1482 = vmatpush3.bf16.msra.mxu1 %v1715_v4  ;;  %v1729_v18 = vld [vmem:[%s2301_s1 + $0x70] sm:$0xff]   ;;  %v1732_v21 = vld [vmem:[%s2301_s1 + $0x78] sm:$0xff]   ;;  %v1737_v23 = vld [vmem:[%s2303_s2 + $0x4] ss:$8 sps:$4 sm:$0xff]  }
   0x8   :  { %1483 = vmatprep.subr.bf16.mxu1 %v1717_v6  ;;  %v1730_v19 = vld [vmem:[%s2301_s1 + $0x30] sm:$0xff]   ;;  %v1734_v22 = vld [vmem:[%s2302_s3 + $0x38] sm:$0xff]   ;;  %v1738_v24 = vld [vmem:[%s2304_s0] sm:$0xff]   ;;  %797 = vmatprep.mubr.bf16.mxu1 %v1737_v23 }
   0x9   :  { %1618 = vmatpush3.bf16.msra.mxu0 %v1716_v5  ;;  %v1731_v20 = vld [vmem:[%s2302_s3 + $0x30] sm:$0xff]   ;;  %v1733_v25 = vld [vmem:[%s2301_s1 + $0x38] sm:$0xff]   ;;  %1631 = vmatprep.mubr.bf16.mxu0 %v1738_v24  ;;  %v1735_v26 = vld [vmem:[%s2303_s2] ss:$8 sps:$4 sm:$0xff]  }
   0xa   :  { %1619 = vmatprep.subr.bf16.mxu0 %v1719_v8  ;;  %v1740_v27 = vld [vmem:[%s2303_s2 + $0x14] ss:$8 sps:$4 sm:$0xff]   ;;  %v1739_v28 = vld [vmem:[%s2304_s0 + $0x8] sm:$0xff]   ;;  %v1742_v30 = vld [vmem:[%s2303_s2 + $0x10] ss:$8 sps:$4 sm:$0xff]  }
   0xb   :  { %1484 = vmatpush3.bf16.msra.mxu1 %v1718_v7  ;;  %v1746_v29 = vld [vmem:[%s2304_s0 + $0x10] sm:$0xff]   ;;  %v1743_v31 = vld [vmem:[%s2303_s2 + $0x24] ss:$8 sps:$4 sm:$0xff]   ;;  %v1747_v32 = vld [vmem:[%s2304_s0 + $0x18] sm:$0xff]  }
   0xc   :  { %1485 = vmatprep.subr.bf16.mxu1 %v1720_v9  ;;  %v1754_v33 = vld [vmem:[%s2304_s0 + $0x20] sm:$0xff]   ;;  %v1748_v35 = vld [vmem:[%s2303_s2 + $0x34] ss:$8 sps:$4 sm:$0xff]   ;;  %v1755_v36 = vld [vmem:[%s2304_s0 + $0x28] sm:$0xff]  }
   0xd   :  { %1620 = vmatpush3.bf16.msra.mxu0 %v1719_v8  ;;  %v1745_v34 = vld [vmem:[%s2303_s2 + $0x20] ss:$8 sps:$4 sm:$0xff]   ;;  %v1762_v37 = vld [vmem:[%s2304_s0 + $0x30] sm:$0xff]   ;;  %v1751_v39 = vld [vmem:[%s2303_s2 + $0x44] ss:$8 sps:$4 sm:$0xff]  }
   0xe   :  { %1621 = vmatprep.subr.bf16.mxu0 %v1722_v11  ;;  %v1750_v38 = vld [vmem:[%s2303_s2 + $0x30] ss:$8 sps:$4 sm:$0xff]   ;;  %v1770_v41 = vld [vmem:[%s2304_s0 + $0x40] sm:$0xff]   ;;  %v1756_v43 = vld [vmem:[%s2303_s2 + $0x54] ss:$8 sps:$4 sm:$0xff]  }
   0xf   :  { %1486 = vmatpush3.bf16.msra.mxu1 %v1721_v10  ;;  %v1763_v40 = vld [vmem:[%s2304_s0 + $0x38] sm:$0xff]   ;;  %v1753_v42 = vld [vmem:[%s2303_s2 + $0x40] ss:$8 sps:$4 sm:$0xff]   ;;  %v1778_v46 = vld [vmem:[%s2304_s0 + $0x50] sm:$0xff]  }
  0x10   :  { %1487 = vmatprep.subr.bf16.mxu1 %v1723_v12  ;;  %v1771_v44 = vld [vmem:[%s2304_s0 + $0x48] sm:$0xff]   ;;  %v1799_v45 = vld [vmem:[%s2305_s5] sm:$0xff]   ;;  %v1801_v48 = vld [vmem:[%s2305_s5 + $0x10] sm:$0xff]  }
  0x11   :  { %1622 = vmatpush3.bf16.msra.mxu0 %v1722_v11  ;;  %v1800_v47 = vld [vmem:[%s2305_s5 + $0x8] sm:$0xff]   ;;  %v1758_v49 = vld [vmem:[%s2303_s2 + $0x50] ss:$8 sps:$4 sm:$0xff]   ;;  %v1786_v52 = vld [vmem:[%s2304_s0 + $0x60] sm:$0xff]  }
  0x12   :  { %1623 = vmatprep.subr.bf16.mxu0 %v1725_v13  ;;  %v1759_v50 = vld [vmem:[%s2303_s2 + $0x64] ss:$8 sps:$4 sm:$0xff]   ;;  %v1779_v51 = vld [vmem:[%s2304_s0 + $0x58] sm:$0xff]   ;;  %v1761_v53 = vld [vmem:[%s2303_s2 + $0x60] ss:$8 sps:$4 sm:$0xff]  }
  0x13   :  { %1488 = vmatpush3.bf16.msra.mxu1 %v1724_v14  ;;  %v1764_v54 = vld [vmem:[%s2303_s2 + $0x74] ss:$8 sps:$4 sm:$0xff]   ;;  %v1787_v55 = vld [vmem:[%s2304_s0 + $0x68] sm:$0xff]   ;;  %v1766_v57 = vld [vmem:[%s2303_s2 + $0x70] ss:$8 sps:$4 sm:$0xff]  }
  0x14   :  { %1489 = vmatprep.subr.bf16.mxu1 %v1726_v15  ;;  %v1794_v56 = vld [vmem:[%s2304_s0 + $0x70] sm:$0xff]   ;;  %v1767_v58 = vld [vmem:[%s2303_s2 + $0x84] ss:$8 sps:$4 sm:$0xff]   ;;  %v1795_v59 = vld [vmem:[%s2304_s0 + $0x78] sm:$0xff]  }
  0x15   :  { %1624 = vmatpush3.bf16.msra.mxu0 %v1725_v13  ;;  %v1769_v60 = vld [vmem:[%s2303_s2 + $0x80] ss:$8 sps:$4 sm:$0xff]   ;;  %v1772_v61 = vld [vmem:[%s2303_s2 + $0x94] ss:$8 sps:$4 sm:$0xff]   ;;  %v1774_v62 = vld [vmem:[%s2303_s2 + $0x90] ss:$8 sps:$4 sm:$0xff]  }
  0x16   :  { %1625 = vmatprep.subr.bf16.mxu0 %v1728_v16  ;;  %v1775_v63 = vld [vmem:[%s2303_s2 + $0xa4] ss:$8 sps:$4 sm:$0xff]   ;;  %v1777_v0 = vld [vmem:[%s2303_s2 + $0xa0] ss:$8 sps:$4 sm:$0xff]   ;;  %v1780_v1 = vld [vmem:[%s2303_s2 + $0xb4] ss:$8 sps:$4 sm:$0xff]  }
  0x17   :  { %1490 = vmatpush3.bf16.msra.mxu1 %v1727_v17  ;;  %v1802_v2 = vld [vmem:[%s2305_s5 + $0x18] sm:$0xff]   ;;  %v1783_v4 = vld [vmem:[%s2303_s2 + $0xc4] ss:$8 sps:$4 sm:$0xff]   ;;  %v1785_v7 = vld [vmem:[%s2303_s2 + $0xc0] ss:$8 sps:$4 sm:$0xff]  }
  0x18   :  { %1491 = vmatprep.subr.bf16.mxu1 %v1729_v18  ;;  %v1782_v3 = vld [vmem:[%s2303_s2 + $0xb0] ss:$8 sps:$4 sm:$0xff]   ;;  %v1803_v5 = vld [vmem:[%s2305_s5 + $0x20] sm:$0xff]   ;;  %v1804_v6 = vld [vmem:[%s2305_s5 + $0x28] sm:$0xff]  }
  0x19   :  { %1626 = vmatpush3.bf16.msra.mxu0 %v1728_v16  ;;  %v1788_v8 = vld [vmem:[%s2303_s2 + $0xd4] ss:$8 sps:$4 sm:$0xff]   ;;  %v1790_v11 = vld [vmem:[%s2303_s2 + $0xd0] ss:$8 sps:$4 sm:$0xff]   ;;  %v1791_v12 = vld [vmem:[%s2303_s2 + $0xe4] ss:$8 sps:$4 sm:$0xff]  }
  0x1a   :  { %1627 = vmatprep.subr.bf16.mxu0 %v1731_v20  ;;  %v1805_v9 = vld [vmem:[%s2305_s5 + $0x30] sm:$0xff]   ;;  %v1806_v10 = vld [vmem:[%s2305_s5 + $0x38] sm:$0xff]   ;;  %v1793_v13 = vld [vmem:[%s2303_s2 + $0xe0] ss:$8 sps:$4 sm:$0xff]  }
  0x1b   :  { %1492 = vmatpush3.bf16.msra.mxu1 %v1730_v19  ;;  %v1796_v14 = vld [vmem:[%s2303_s2 + $0xf4] ss:$8 sps:$4 sm:$0xff]   ;;  %v1798_v15 = vld [vmem:[%s2303_s2 + $0xf0] ss:$8 sps:$4 sm:$0xff]  }
  0x1c   :  { %1493 = vmatprep.subr.bf16.mxu1 %v1732_v21 }
  0x1d   :  { %1628 = vmatpush3.bf16.msra.mxu0 %v1731_v20 }
  0x1e   :  { %1629 = vmatprep.subr.bf16.mxu0 %v1734_v22 }
  0x1f   :  { %1494 = vmatpush3.bf16.msra.mxu1 %v1733_v25 }
  0x21   :  { %1630 = vmatpush3.bf16.msra.mxu0 %v1734_v22  ;;  %v2085_v22 = vld [vmem:[%s2306_s4] ss:$0 sm:$0xff] }
  0x22   :  { %798 = vmatmul.mubr.bf16.vlgmr.msra.gmra.mrb[0].mxu1 %v1735_v26  ;;  %1663 = vmatprep.subr.bf16.mxu0 %v1799_v45 }
  0x23   :  { %805 = vmatprep.mubr.bf16.mxu1 %v1740_v27 }
  0x24   :  { %1632 = vmatmul.mubr.bf16.vlgmr.msra.gmra.mrb[0].mxu0 %v1739_v28 }
  0x25   :  { %1635 = vmatprep.mubr.bf16.mxu0 %v1746_v29  ;;  %1664 = vmatpush3.bf16.msra.mxu0 %v1799_v45 }
  0x26   :  { %1665 = vmatprep.subr.bf16.mxu0 %v1800_v47 }
  0x29   :  { %1666 = vmatpush3.bf16.msra.mxu0 %v1800_v47 }
  0x2a   :  { %806 = vmatmul.mubr.bf16.gmra.mrb[4].mxu1 %v1742_v30  ;;  %1667 = vmatprep.subr.bf16.mxu0 %v1801_v48 }
  0x2b   :  { %813 = vmatprep.mubr.bf16.mxu1 %v1743_v31 }
  0x2c   :  { %1636 = vmatmul.mubr.bf16.gmra.mrb[4].mxu0 %v1747_v32 }
  0x2d   :  { %1639 = vmatprep.mubr.bf16.mxu0 %v1754_v33  ;;  %1668 = vmatpush3.bf16.msra.mxu0 %v1801_v48 }
  0x2e   :  { %1669 = vmatprep.subr.bf16.mxu0 %v1802_v2 }
  0x31   :  { %1670 = vmatpush3.bf16.msra.mxu0 %v1802_v2 }
  0x32   :  { %814 = vmatmul.mubr.bf16.gmra.mrb[8].mxu1 %v1745_v34  ;;  %1671 = vmatprep.subr.bf16.mxu0 %v1803_v5 }
  0x33   :  { %821 = vmatprep.mubr.bf16.mxu1 %v1748_v35 }
  0x34   :  { %1640 = vmatmul.mubr.bf16.gmra.mrb[8].mxu0 %v1755_v36 }
  0x35   :  { %1643 = vmatprep.mubr.bf16.mxu0 %v1762_v37  ;;  %1672 = vmatpush3.bf16.msra.mxu0 %v1803_v5 }
  0x36   :  { %1673 = vmatprep.subr.bf16.mxu0 %v1804_v6 }
  0x39   :  { %1674 = vmatpush3.bf16.msra.mxu0 %v1804_v6 }
  0x3a   :  { %822 = vmatmul.mubr.bf16.gmra.mrb[12].mxu1 %v1750_v38  ;;  %1675 = vmatprep.subr.bf16.mxu0 %v1805_v9 }
  0x3b   :  { %829 = vmatprep.mubr.bf16.mxu1 %v1751_v39 }
  0x3c   :  { %1644 = vmatmul.mubr.bf16.gmra.mrb[12].mxu0 %v1763_v40 }
  0x3d   :  { %1647 = vmatprep.mubr.bf16.mxu0 %v1770_v41  ;;  %1676 = vmatpush3.bf16.msra.mxu0 %v1805_v9 }
  0x3e   :  { %1677 = vmatprep.subr.bf16.mxu0 %v1806_v10 }
  0x41   :  { %1678 = vmatpush3.bf16.msra.mxu0 %v1806_v10 }
  0x42   :  { %830 = vmatmul.mubr.bf16.gmra.mrb[16].mxu1 %v1753_v42 }
  0x43   :  { %837 = vmatprep.mubr.bf16.mxu1 %v1756_v43 }
  0x44   :  { %1648 = vmatmul.mubr.bf16.gmra.mrb[16].mxu0 %v1771_v44 }
  0x45   :  { %1651 = vmatprep.mubr.bf16.mxu0 %v1778_v46 }
  0x4a   :  { %838 = vmatmul.mubr.bf16.gmra.mrb[20].mxu1 %v1758_v49 }
  0x4b   :  { %845 = vmatprep.mubr.bf16.mxu1 %v1759_v50 }
  0x4c   :  { %1652 = vmatmul.mubr.bf16.gmra.mrb[20].mxu0 %v1779_v51 }
  0x4d   :  { %1655 = vmatprep.mubr.bf16.mxu0 %v1786_v52 }
  0x52   :  { %846 = vmatmul.mubr.bf16.gmra.mrb[24].mxu1 %v1761_v53 }
  0x53   :  { %853 = vmatprep.mubr.bf16.mxu1 %v1764_v54 }
  0x54   :  { %1656 = vmatmul.mubr.bf16.gmra.mrb[24].mxu0 %v1787_v55 }
  0x55   :  { %1659 = vmatprep.mubr.bf16.mxu0 %v1794_v56 }
  0x5a   :  { %854 = vmatmul.mubr.bf16.gmra.mrb[28].mxu1 %v1766_v57 }
  0x5b   :  { %861 = vmatprep.mubr.bf16.mxu1 %v1767_v58 }
  0x5c   :  { %1660 = vmatmul.mubr.bf16.gmra.mrb[28].mxu0 %v1795_v59 }
  0x62   :  { %862 = vmatmul.mubr.bf16.gmra.mrb[32].mxu1 %v1769_v60 }
  0x63   :  { %869 = vmatprep.mubr.bf16.mxu1 %v1772_v61 }
  0x6a   :  { %870 = vmatmul.mubr.bf16.gmra.mrb[36].mxu1 %v1774_v62 }
  0x6b   :  { %877 = vmatprep.mubr.bf16.mxu1 %v1775_v63 }
  0x72   :  { %878 = vmatmul.mubr.bf16.gmra.mrb[40].mxu1 %v1777_v0 }
  0x73   :  { %885 = vmatprep.mubr.bf16.mxu1 %v1780_v1 }
  0x7a   :  { %886 = vmatmul.mubr.bf16.gmra.mrb[44].mxu1 %v1782_v3 }
  0x7b   :  { %893 = vmatprep.mubr.bf16.mxu1 %v1783_v4 }
  0x82   :  { %894 = vmatmul.mubr.bf16.gmra.mrb[48].mxu1 %v1785_v7 }
  0x83   :  { %901 = vmatprep.mubr.bf16.mxu1 %v1788_v8 }
  0x8a   :  { %902 = vmatmul.mubr.bf16.gmra.mrb[52].mxu1 %v1790_v11 }
  0x8b   :  { %909 = vmatprep.mubr.bf16.mxu1 %v1791_v12 }
  0x92   :  { %910 = vmatmul.mubr.bf16.gmra.mrb[56].mxu1 %v1793_v13 }
  0x93   :  { %917 = vmatprep.mubr.bf16.mxu1 %v1796_v14 }
  0x9a   :  { %918 = vmatmul.mubr.bf16.gmra.mrb[60].mxu1 %v1798_v15 }
  0xf5   :  { %v1495_v16 = vpop.f32.mrb[0].mxu1 }
  0xf6   :  { %v1496_v17 = vpop.f32.mrb[1].mxu1 }
  0xf7   :  { %v1497_v18 = vadd.f32 %v1496_v17, %v1495_v16  ;;  %v1633_v19 = vpop.f32.mrb[0].mxu0  ;;  %v1498_v20 = vpop.f32.mrb[2].mxu1 }
  0xf8   :  { %v254_v21 = vpop.f32.mrb[1].mxu0  ;;  %v1499_v23 = vpop.f32.mrb[3].mxu1 }
  0xf9   :  { %v926_v24 = vadd.f32 %v1497_v18, %v254_v21  ;;  %v1500_v25 = vadd.f32 %v1499_v23, %v1498_v20  ;;  %v1634_v26 = vpop.f32.mrb[2].mxu0 }
  0xfa   :  { %v257_v27 = vpop.f32.mrb[3].mxu0 }
  0xfb   :  { %v1032_v28 = vadd.f32 %v2085_v22, %v926_v24  ;;  %v927_v29 = vadd.f32 %v1500_v25, %v257_v27 }
  0xfd   :  { %v1033_v30 = vadd.f32 %v2085_v22, %v927_v29  ;;  %v1501_v31 = vpop.f32.mrb[4].mxu1  ;;  %v1064_v33 = vmax.f32 %v1032_v28, 0.0 }
  0xfe   :  { %v1502_v32 = vpop.f32.mrb[5].mxu1 }
  0xff   :  { %v1065_v34 = vmax.f32 %v1033_v30, 0.0  ;;  %v1503_v35 = vadd.f32 %v1502_v32, %v1501_v31  ;;  %v1504_v36 = vpop.f32.mrb[6].mxu1  ;;  %v1637_v37 = vpop.f32.mrb[4].mxu0 }
 0x100   :  { %v1505_v38 = vpop.f32.mrb[7].mxu1  ;;  %v270_v39 = vpop.f32.mrb[5].mxu0 }
 0x101   :  { %v928_v40 = vadd.f32 %v1633_v19, %v1503_v35  ;;  %v1506_v41 = vadd.f32 %v1505_v38, %v1504_v36  ;;  %v1096_v42 = vpack.c.bf16 %v1065_v34, %v1064_v33  ;;  %v1638_v43 = vpop.f32.mrb[6].mxu0 }
 0x102   :  { %v273_v44 = vpop.f32.mrb[7].mxu0 }
 0x103   :  { %v1034_v45 = vadd.f32 %v2085_v22, %v928_v40  ;;  %v929_v46 = vadd.f32 %v1634_v26, %v1506_v41  ;;  %1679 = vmatprep.mubr.bf16.mxu0 %v1096_v42 }
 0x105   :  { %v1035_v47 = vadd.f32 %v2085_v22, %v929_v46  ;;  %v1507_v48 = vpop.f32.mrb[8].mxu1  ;;  %v1066_v50 = vmax.f32 %v1034_v45, 0.0 }
 0x106   :  { %v1508_v49 = vpop.f32.mrb[9].mxu1 }
 0x107   :  { %v1067_v51 = vmax.f32 %v1035_v47, 0.0  ;;  %v1509_v52 = vadd.f32 %v1508_v49, %v1507_v48  ;;  %v1510_v53 = vpop.f32.mrb[10].mxu1  ;;  %v1641_v54 = vpop.f32.mrb[8].mxu0 }
 0x108   :  { %v1511_v55 = vpop.f32.mrb[11].mxu1  ;;  %v286_v56 = vpop.f32.mrb[9].mxu0 }
 0x109   :  { %v1097_v57 = vpack.c.bf16 %v1067_v51, %v1066_v50  ;;  %v930_v58 = vadd.f32 %v1509_v52, %v270_v39  ;;  %v1512_v59 = vadd.f32 %v1511_v55, %v1510_v53  ;;  %v1642_v60 = vpop.f32.mrb[10].mxu0 }
 0x10a   :  { %v289_v61 = vpop.f32.mrb[11].mxu0 }
 0x10b   :  { %v1036_v62 = vadd.f32 %v2085_v22, %v930_v58  ;;  %v931_v63 = vadd.f32 %v1512_v59, %v273_v44  ;;  %1680 = vmatmul.mubr.bf16.vlgmr.msra.gmra.mrb[32].mxu0 %v1097_v57 }
 0x10d   :  { %v1037_v0 = vadd.f32 %v2085_v22, %v931_v63  ;;  %v1513_v1 = vpop.f32.mrb[12].mxu1  ;;  %v1068_v3 = vmax.f32 %v1036_v62, 0.0 }
 0x10e   :  { %v1514_v2 = vpop.f32.mrb[13].mxu1 }
 0x10f   :  { %v1069_v4 = vmax.f32 %v1037_v0, 0.0  ;;  %v1515_v5 = vadd.f32 %v1514_v2, %v1513_v1  ;;  %v1516_v6 = vpop.f32.mrb[14].mxu1  ;;  %v2093_v7 = vpop.f32.mrb[12].mxu0 }
 0x110   :  { %v1517_v8 = vpop.f32.mrb[15].mxu1  ;;  %v302_v9 = vpop.f32.mrb[13].mxu0 }
 0x111   :  { %v932_v10 = vadd.f32 %v1637_v37, %v1515_v5  ;;  %v1518_v11 = vadd.f32 %v1517_v8, %v1516_v6  ;;  %v1098_v12 = vpack.c.bf16 %v1069_v4, %v1068_v3  ;;  %v2095_v13 = vpop.f32.mrb[14].mxu0 }
 0x112   :  { %v305_v14 = vpop.f32.mrb[15].mxu0 }
 0x113   :  { %v1038_v15 = vadd.f32 %v2085_v22, %v932_v10  ;;  %v933_v16 = vadd.f32 %v1638_v43, %v1518_v11  ;;  %1683 = vmatprep.mubr.bf16.mxu0 %v1098_v12 }
 0x115   :  { %v1039_v17 = vadd.f32 %v2085_v22, %v933_v16  ;;  %v1519_v18 = vpop.f32.mrb[16].mxu1  ;;  %v1070_v20 = vmax.f32 %v1038_v15, 0.0 }
 0x116   :  { %v1520_v19 = vpop.f32.mrb[17].mxu1 }
 0x117   :  { %v1071_v21 = vmax.f32 %v1039_v17, 0.0  ;;  %v1521_v23 = vadd.f32 %v1520_v19, %v1519_v18  ;;  %v1522_v24 = vpop.f32.mrb[18].mxu1  ;;  %v2099_v25 = vpop.f32.mrb[16].mxu0 }
 0x118   :  { %v1523_v26 = vpop.f32.mrb[19].mxu1  ;;  %v2101_v27 = vpop.f32.mrb[17].mxu0 }
 0x119   :  { %v934_v28 = vadd.f32 %v1521_v23, %v286_v56  ;;  %v1524_v29 = vadd.f32 %v1523_v26, %v1522_v24  ;;  %v1099_v30 = vpack.c.bf16 %v1071_v21, %v1070_v20  ;;  %v2103_v31 = vpop.f32.mrb[18].mxu0 }
 0x11a   :  { %v2105_v32 = vpop.f32.mrb[19].mxu0 }
 0x11b   :  { %v1040_v33 = vadd.f32 %v2085_v22, %v934_v28  ;;  %v935_v34 = vadd.f32 %v1524_v29, %v289_v61  ;;  %1684 = vmatmul.mubr.bf16.gmra.mrb[36].mxu0 %v1099_v30 }
 0x11d   :  { %v1041_v35 = vadd.f32 %v2085_v22, %v935_v34  ;;  %v1525_v36 = vpop.f32.mrb[20].mxu1  ;;  %v1072_v38 = vmax.f32 %v1040_v33, 0.0 }
 0x11e   :  { %v1526_v37 = vpop.f32.mrb[21].mxu1 }
 0x11f   :  { %v1073_v39 = vmax.f32 %v1041_v35, 0.0  ;;  %v1527_v40 = vadd.f32 %v1526_v37, %v1525_v36  ;;  %v1528_v41 = vpop.f32.mrb[22].mxu1  ;;  %v2109_v42 = vpop.f32.mrb[20].mxu0 }
 0x120   :  { %v1529_v43 = vpop.f32.mrb[23].mxu1  ;;  %v2111_v44 = vpop.f32.mrb[21].mxu0 }
 0x121   :  { %v936_v45 = vadd.f32 %v1641_v54, %v1527_v40  ;;  %v1530_v46 = vadd.f32 %v1529_v43, %v1528_v41  ;;  %v1100_v47 = vpack.c.bf16 %v1073_v39, %v1072_v38  ;;  %v2113_v48 = vpop.f32.mrb[22].mxu0 }
 0x122   :  { %v2115_v49 = vpop.f32.mrb[23].mxu0 }
 0x123   :  { %v1042_v50 = vadd.f32 %v2085_v22, %v936_v45  ;;  %v937_v51 = vadd.f32 %v1642_v60, %v1530_v46  ;;  %1687 = vmatprep.mubr.bf16.mxu0 %v1100_v47 }
 0x125   :  { %v1043_v52 = vadd.f32 %v2085_v22, %v937_v51  ;;  %v1531_v53 = vpop.f32.mrb[24].mxu1  ;;  %v1074_v56 = vmax.f32 %v1042_v50, 0.0 }
 0x126   :  { %v1532_v55 = vpop.f32.mrb[25].mxu1 }
 0x127   :  { %v1075_v57 = vmax.f32 %v1043_v52, 0.0  ;;  %v1533_v58 = vadd.f32 %v1532_v55, %v1531_v53  ;;  %v1534_v59 = vpop.f32.mrb[26].mxu1  ;;  %v2119_v61 = vpop.f32.mrb[24].mxu0 }
 0x128   :  { %v1535_v54 = vpop.f32.mrb[27].mxu1  ;;  %v2121_v62 = vpop.f32.mrb[25].mxu0 }
 0x129   :  { %v938_v63 = vadd.f32 %v1533_v58, %v302_v9  ;;  %v1536_v0 = vadd.f32 %v1535_v54, %v1534_v59  ;;  %v1101_v1 = vpack.c.bf16 %v1075_v57, %v1074_v56  ;;  %v2123_v2 = vpop.f32.mrb[26].mxu0 }
 0x12a   :  { %v2125_v60 = vpop.f32.mrb[27].mxu0 }
 0x12b   :  { %v1044_v3 = vadd.f32 %v2085_v22, %v938_v63  ;;  %v939_v4 = vadd.f32 %v1536_v0, %v305_v14  ;;  %1688 = vmatmul.mubr.bf16.gmra.mrb[40].mxu0 %v1101_v1 }
 0x12d   :  { %v1045_v5 = vadd.f32 %v2085_v22, %v939_v4  ;;  %v1537_v6 = vpop.f32.mrb[28].mxu1  ;;  %v1076_v10 = vmax.f32 %v1044_v3, 0.0 }
 0x12e   :  { %v1538_v8 = vpop.f32.mrb[29].mxu1 }
 0x12f   :  { %v1077_v11 = vmax.f32 %v1045_v5, 0.0  ;;  %v1539_v12 = vadd.f32 %v1538_v8, %v1537_v6  ;;  %v1540_v15 = vpop.f32.mrb[30].mxu1  ;;  %v2129_v16 = vpop.f32.mrb[28].mxu0 }
 0x130   :  { %v1541_v9 = vpop.f32.mrb[31].mxu1  ;;  %v2131_v17 = vpop.f32.mrb[29].mxu0 }
 0x131   :  { %v940_v18 = vadd.f32 %v2093_v7, %v1539_v12  ;;  %v1542_v19 = vadd.f32 %v1541_v9, %v1540_v15  ;;  %v1102_v20 = vpack.c.bf16 %v1077_v11, %v1076_v10  ;;  %v2134_v21 = vpop.f32.mrb[30].mxu0 }
 0x132   :  { %v2136_v14 = vpop.f32.mrb[31].mxu0 }
 0x133   :  { %v1046_v23 = vadd.f32 %v2085_v22, %v940_v18  ;;  %v941_v24 = vadd.f32 %v2095_v13, %v1542_v19  ;;  %1691 = vmatprep.mubr.bf16.mxu0 %v1102_v20 }
 0x135   :  { %v1047_v26 = vadd.f32 %v2085_v22, %v941_v24  ;;  %v1543_v28 = vpop.f32.mrb[32].mxu1  ;;  %v1078_v30 = vmax.f32 %v1046_v23, 0.0 }
 0x136   :  { %v1544_v29 = vpop.f32.mrb[33].mxu1 }
 0x137   :  { %v1079_v33 = vmax.f32 %v1047_v26, 0.0  ;;  %v1545_v34 = vadd.f32 %v1544_v29, %v1543_v28  ;;  %v1546_v35 = vpop.f32.mrb[34].mxu1 }
 0x138   :  { %v1547_v7 = vpop.f32.mrb[35].mxu1 }
 0x139   :  { %v942_v36 = vadd.f32 %v1545_v34, %v2101_v27  ;;  %v1548_v37 = vadd.f32 %v1547_v7, %v1546_v35  ;;  %v1103_v38 = vpack.c.bf16 %v1079_v33, %v1078_v30 }
 0x13b   :  { %v1048_v39 = vadd.f32 %v2085_v22, %v942_v36  ;;  %v943_v40 = vadd.f32 %v1548_v37, %v2105_v32  ;;  %1692 = vmatmul.mubr.bf16.gmra.mrb[44].mxu0 %v1103_v38 }
 0x13d   :  { %v1049_v13 = vadd.f32 %v2085_v22, %v943_v40  ;;  %v1549_v41 = vpop.f32.mrb[36].mxu1  ;;  %v1080_v45 = vmax.f32 %v1048_v39, 0.0 }
 0x13e   :  { %v1550_v43 = vpop.f32.mrb[37].mxu1 }
 0x13f   :  { %v1081_v46 = vmax.f32 %v1049_v13, 0.0  ;;  %v1551_v47 = vadd.f32 %v1550_v43, %v1549_v41  ;;  %v1552_v50 = vpop.f32.mrb[38].mxu1 }
 0x140   :  { %v1553_v51 = vpop.f32.mrb[39].mxu1 }
 0x141   :  { %v944_v52 = vadd.f32 %v2099_v25, %v1551_v47  ;;  %v1554_v53 = vadd.f32 %v1553_v51, %v1552_v50  ;;  %v1104_v27 = vpack.c.bf16 %v1081_v46, %v1080_v45 }
 0x143   :  { %v1050_v55 = vadd.f32 %v2085_v22, %v944_v52  ;;  %v945_v56 = vadd.f32 %v2103_v31, %v1554_v53  ;;  %1695 = vmatprep.mubr.bf16.mxu0 %v1104_v27 }
 0x145   :  { %v1051_v32 = vadd.f32 %v2085_v22, %v945_v56  ;;  %v1555_v57 = vpop.f32.mrb[40].mxu1  ;;  %v1082_v59 = vmax.f32 %v1050_v55, 0.0 }
 0x146   :  { %v1556_v58 = vpop.f32.mrb[41].mxu1 }
 0x147   :  { %v1083_v54 = vmax.f32 %v1051_v32, 0.0  ;;  %v1557_v63 = vadd.f32 %v1556_v58, %v1555_v57  ;;  %v1558_v0 = vpop.f32.mrb[42].mxu1 }
 0x148   :  { %v1559_v1 = vpop.f32.mrb[43].mxu1 }
 0x149   :  { %v946_v3 = vadd.f32 %v1557_v63, %v2111_v44  ;;  %v1560_v4 = vadd.f32 %v1559_v1, %v1558_v0  ;;  %v1105_v25 = vpack.c.bf16 %v1083_v54, %v1082_v59 }
 0x14b   :  { %v1052_v5 = vadd.f32 %v2085_v22, %v946_v3  ;;  %v947_v6 = vadd.f32 %v1560_v4, %v2115_v49  ;;  %1696 = vmatmul.mubr.bf16.gmra.mrb[48].mxu0 %v1105_v25 }
 0x14d   :  { %v1053_v31 = vadd.f32 %v2085_v22, %v947_v6  ;;  %v1561_v8 = vpop.f32.mrb[44].mxu1  ;;  %v1084_v11 = vmax.f32 %v1052_v5, 0.0 }
 0x14e   :  { %v1562_v10 = vpop.f32.mrb[45].mxu1 }
 0x14f   :  { %v1085_v12 = vmax.f32 %v1053_v31, 0.0  ;;  %v1563_v15 = vadd.f32 %v1562_v10, %v1561_v8  ;;  %v1564_v9 = vpop.f32.mrb[46].mxu1 }
 0x150   :  { %v1565_v18 = vpop.f32.mrb[47].mxu1 }
 0x151   :  { %v948_v19 = vadd.f32 %v2109_v42, %v1563_v15  ;;  %v1566_v20 = vadd.f32 %v1565_v18, %v1564_v9  ;;  %v1106_v44 = vpack.c.bf16 %v1085_v12, %v1084_v11 }
 0x153   :  { %v1054_v23 = vadd.f32 %v2085_v22, %v948_v19  ;;  %v949_v24 = vadd.f32 %v2113_v48, %v1566_v20  ;;  %1699 = vmatprep.mubr.bf16.mxu0 %v1106_v44 }
 0x155   :  { %v1055_v49 = vadd.f32 %v2085_v22, %v949_v24  ;;  %v1567_v26 = vpop.f32.mrb[48].mxu1  ;;  %v1086_v29 = vmax.f32 %v1054_v23, 0.0 }
 0x156   :  { %v1568_v28 = vpop.f32.mrb[49].mxu1 }
 0x157   :  { %v1087_v30 = vmax.f32 %v1055_v49, 0.0  ;;  %v1569_v33 = vadd.f32 %v1568_v28, %v1567_v26  ;;  %v1570_v34 = vpop.f32.mrb[50].mxu1 }
 0x158   :  { %v1571_v35 = vpop.f32.mrb[51].mxu1 }
 0x159   :  { %v950_v7 = vadd.f32 %v1569_v33, %v2121_v62  ;;  %v1572_v36 = vadd.f32 %v1571_v35, %v1570_v34  ;;  %v1107_v42 = vpack.c.bf16 %v1087_v30, %v1086_v29 }
 0x15b   :  { %v1056_v37 = vadd.f32 %v2085_v22, %v950_v7  ;;  %v951_v38 = vadd.f32 %v1572_v36, %v2125_v60  ;;  %1700 = vmatmul.mubr.bf16.gmra.mrb[52].mxu0 %v1107_v42 }
 0x15d   :  { %v1057_v48 = vadd.f32 %v2085_v22, %v951_v38  ;;  %v1573_v39 = vpop.f32.mrb[52].mxu1  ;;  %v1088_v13 = vmax.f32 %v1056_v37, 0.0 }
 0x15e   :  { %v1574_v40 = vpop.f32.mrb[53].mxu1 }
 0x15f   :  { %v1089_v41 = vmax.f32 %v1057_v48, 0.0  ;;  %v1575_v43 = vadd.f32 %v1574_v40, %v1573_v39  ;;  %v1576_v45 = vpop.f32.mrb[54].mxu1 }
 0x160   :  { %v1577_v46 = vpop.f32.mrb[55].mxu1 }
 0x161   :  { %v952_v47 = vadd.f32 %v2119_v61, %v1575_v43  ;;  %v1578_v50 = vadd.f32 %v1577_v46, %v1576_v45  ;;  %v1108_v62 = vpack.c.bf16 %v1089_v41, %v1088_v13 }
 0x163   :  { %v1058_v51 = vadd.f32 %v2085_v22, %v952_v47  ;;  %v953_v52 = vadd.f32 %v2123_v2, %v1578_v50  ;;  %1703 = vmatprep.mubr.bf16.mxu0 %v1108_v62 }
 0x165   :  { %v1059_v60 = vadd.f32 %v2085_v22, %v953_v52  ;;  %v1579_v53 = vpop.f32.mrb[56].mxu1  ;;  %v1090_v55 = vmax.f32 %v1058_v51, 0.0 }
 0x166   :  { %v1580_v27 = vpop.f32.mrb[57].mxu1 }
 0x167   :  { %v1091_v56 = vmax.f32 %v1059_v60, 0.0  ;;  %v1581_v32 = vadd.f32 %v1580_v27, %v1579_v53  ;;  %v1582_v57 = vpop.f32.mrb[58].mxu1 }
 0x168   :  { %v1583_v58 = vpop.f32.mrb[59].mxu1 }
 0x169   :  { %v954_v59 = vadd.f32 %v1581_v32, %v2131_v17  ;;  %v1584_v54 = vadd.f32 %v1583_v58, %v1582_v57  ;;  %v1109_v61 = vpack.c.bf16 %v1091_v56, %v1090_v55 }
 0x16b   :  { %v1060_v63 = vadd.f32 %v2085_v22, %v954_v59  ;;  %v955_v0 = vadd.f32 %v1584_v54, %v2136_v14  ;;  %1704 = vmatmul.mubr.bf16.gmra.mrb[56].mxu0 %v1109_v61 }
 0x16d   :  { %v1061_v2 = vadd.f32 %v2085_v22, %v955_v0  ;;  %v1585_v1 = vpop.f32.mrb[60].mxu1  ;;  %v1092_v4 = vmax.f32 %v1060_v63, 0.0 }
 0x16e   :  { %v1586_v3 = vpop.f32.mrb[61].mxu1 }
 0x16f   :  { %v1093_v25 = vmax.f32 %v1061_v2, 0.0  ;;  %v1587_v5 = vadd.f32 %v1586_v3, %v1585_v1  ;;  %v1588_v6 = vpop.f32.mrb[62].mxu1 }
 0x170   :  { %v1589_v31 = vpop.f32.mrb[63].mxu1 }
 0x171   :  { %v956_v8 = vadd.f32 %v2129_v16, %v1587_v5  ;;  %v1590_v10 = vadd.f32 %v1589_v31, %v1588_v6  ;;  %v1110_v17 = vpack.c.bf16 %v1093_v25, %v1092_v4 }
 0x173   :  { %v1062_v11 = vadd.f32 %v2085_v22, %v956_v8  ;;  %v957_v12 = vadd.f32 %v2134_v21, %v1590_v10  ;;  %1707 = vmatprep.mubr.bf16.mxu0 %v1110_v17 }
 0x175   :  { %v1063_v14 = vadd.f32 %v2085_v22, %v957_v12  ;;  %v1094_v15 = vmax.f32 %v1062_v11, 0.0 }
 0x177   :  { %v1095_v9 = vmax.f32 %v1063_v14, 0.0 }
 0x179   :  { %v1111_v18 = vpack.c.bf16 %v1095_v9, %v1094_v15 }
 0x17b   :  { %1708 = vmatmul.mubr.bf16.gmra.mrb[60].mxu0 %v1111_v18 }
 0x1de   :  { %v1681_v19 = vpop.f32.mrb[32].mxu0 }
 0x1df   :  { %1340 = vst.msk [vmem:[%s2307_s6 + $0x10] sm:$0xff] %vm1337_vm0, %v1681_v19  ;;  %v1210_v16 = vpop.f32.mrb[33].mxu0 }
 0x1e0   :  { %1338 = vst.msk [vmem:[%s2307_s6] sm:$0xff] %vm1337_vm0, %v1210_v16  ;;  %v1682_v21 = vpop.f32.mrb[34].mxu0 }
 0x1e1   :  { %1341 = vst.msk [vmem:[%s2307_s6 + $0x18] sm:$0xff] %vm1337_vm0, %v1682_v21  ;;  %v1213_v22 = vpop.f32.mrb[35].mxu0 }
 0x1e2   :  { %1339 = vst.msk [vmem:[%s2307_s6 + $0x8] sm:$0xff] %vm1337_vm0, %v1213_v22 }
 0x1ee   :  { %v1685_v20 = vpop.f32.mrb[36].mxu0 }
 0x1ef   :  { %1344 = vst.msk [vmem:[%s2307_s6 + $0x30] sm:$0xff] %vm1337_vm0, %v1685_v20  ;;  %v1226_v44 = vpop.f32.mrb[37].mxu0 }
 0x1f0   :  { %1342 = vst.msk [vmem:[%s2307_s6 + $0x20] sm:$0xff] %vm1337_vm0, %v1226_v44  ;;  %v1686_v23 = vpop.f32.mrb[38].mxu0 }
 0x1f1   :  { %1345 = vst.msk [vmem:[%s2307_s6 + $0x38] sm:$0xff] %vm1337_vm0, %v1686_v23  ;;  %v1229_v24 = vpop.f32.mrb[39].mxu0 }
 0x1f2   :  { %1343 = vst.msk [vmem:[%s2307_s6 + $0x28] sm:$0xff] %vm1337_vm0, %v1229_v24 }
 0x1fe   :  { %v1689_v49 = vpop.f32.mrb[40].mxu0 }
 0x1ff   :  { %1348 = vst.msk [vmem:[%s2307_s6 + $0x50] sm:$0xff] %vm1337_vm0, %v1689_v49  ;;  %v1242_v26 = vpop.f32.mrb[41].mxu0 }
 0x200   :  { %1346 = vst.msk [vmem:[%s2307_s6 + $0x40] sm:$0xff] %vm1337_vm0, %v1242_v26  ;;  %v1690_v28 = vpop.f32.mrb[42].mxu0 }
 0x201   :  { %1349 = vst.msk [vmem:[%s2307_s6 + $0x58] sm:$0xff] %vm1337_vm0, %v1690_v28  ;;  %v1245_v29 = vpop.f32.mrb[43].mxu0 }
 0x202   :  { %1347 = vst.msk [vmem:[%s2307_s6 + $0x48] sm:$0xff] %vm1337_vm0, %v1245_v29 }
 0x20e   :  { %v1693_v30 = vpop.f32.mrb[44].mxu0 }
 0x20f   :  { %1352 = vst.msk [vmem:[%s2307_s6 + $0x70] sm:$0xff] %vm1337_vm0, %v1693_v30  ;;  %v1258_v33 = vpop.f32.mrb[45].mxu0 }
 0x210   :  { %1350 = vst.msk [vmem:[%s2307_s6 + $0x60] sm:$0xff] %vm1337_vm0, %v1258_v33  ;;  %v1694_v34 = vpop.f32.mrb[46].mxu0 }
 0x211   :  { %1353 = vst.msk [vmem:[%s2307_s6 + $0x78] sm:$0xff] %vm1337_vm0, %v1694_v34  ;;  %v1261_v35 = vpop.f32.mrb[47].mxu0 }
 0x212   :  { %1351 = vst.msk [vmem:[%s2307_s6 + $0x68] sm:$0xff] %vm1337_vm0, %v1261_v35 }
 0x21e   :  { %v1697_v7 = vpop.f32.mrb[48].mxu0 }
 0x21f   :  { %1356 = vst.msk [vmem:[%s2307_s6 + $0x90] sm:$0xff] %vm1337_vm0, %v1697_v7  ;;  %v1274_v36 = vpop.f32.mrb[49].mxu0 }
 0x220   :  { %1354 = vst.msk [vmem:[%s2307_s6 + $0x80] sm:$0xff] %vm1337_vm0, %v1274_v36  ;;  %v1698_v42 = vpop.f32.mrb[50].mxu0 }
 0x221   :  { %1357 = vst.msk [vmem:[%s2307_s6 + $0x98] sm:$0xff] %vm1337_vm0, %v1698_v42  ;;  %v1277_v37 = vpop.f32.mrb[51].mxu0 }
 0x222   :  { %1355 = vst.msk [vmem:[%s2307_s6 + $0x88] sm:$0xff] %vm1337_vm0, %v1277_v37 }
 0x22e   :  { %v1701_v38 = vpop.f32.mrb[52].mxu0 }
 0x22f   :  { %1360 = vst.msk [vmem:[%s2307_s6 + $0xb0] sm:$0xff] %vm1337_vm0, %v1701_v38  ;;  %v1290_v48 = vpop.f32.mrb[53].mxu0 }
 0x230   :  { %1358 = vst.msk [vmem:[%s2307_s6 + $0xa0] sm:$0xff] %vm1337_vm0, %v1290_v48  ;;  %v1702_v39 = vpop.f32.mrb[54].mxu0 }
 0x231   :  { %1361 = vst.msk [vmem:[%s2307_s6 + $0xb8] sm:$0xff] %vm1337_vm0, %v1702_v39  ;;  %v1293_v40 = vpop.f32.mrb[55].mxu0 }
 0x232   :  { %1359 = vst.msk [vmem:[%s2307_s6 + $0xa8] sm:$0xff] %vm1337_vm0, %v1293_v40 }
 0x23e   :  { %v1705_v13 = vpop.f32.mrb[56].mxu0 }
 0x23f   :  { %1364 = vst.msk [vmem:[%s2307_s6 + $0xd0] sm:$0xff] %vm1337_vm0, %v1705_v13  ;;  %v1306_v41 = vpop.f32.mrb[57].mxu0 }
 0x240   :  { %1362 = vst.msk [vmem:[%s2307_s6 + $0xc0] sm:$0xff] %vm1337_vm0, %v1306_v41  ;;  %v1706_v43 = vpop.f32.mrb[58].mxu0 }
 0x241   :  { %1365 = vst.msk [vmem:[%s2307_s6 + $0xd8] sm:$0xff] %vm1337_vm0, %v1706_v43  ;;  %v1309_v45 = vpop.f32.mrb[59].mxu0 }
 0x242   :  { %1363 = vst.msk [vmem:[%s2307_s6 + $0xc8] sm:$0xff] %vm1337_vm0, %v1309_v45 }
 0x24e   :  { %v1709_v46 = vpop.f32.mrb[60].mxu0 }
 0x24f   :  { %1368 = vst.msk [vmem:[%s2307_s6 + $0xf0] sm:$0xff] %vm1337_vm0, %v1709_v46  ;;  %v1322_v47 = vpop.f32.mrb[61].mxu0 }
 0x250   :  { %1366 = vst.msk [vmem:[%s2307_s6 + $0xe0] sm:$0xff] %vm1337_vm0, %v1322_v47  ;;  %v1710_v50 = vpop.f32.mrb[62].mxu0 }
 0x251   :  { %1369 = vst.msk [vmem:[%s2307_s6 + $0xf8] sm:$0xff] %vm1337_vm0, %v1710_v50  ;;  %v1325_v62 = vpop.f32.mrb[63].mxu0 }
 0x252   :  { %1367 = vst.msk [vmem:[%s2307_s6 + $0xe8] sm:$0xff] %vm1337_vm0, %v1325_v62 }

// kernel: graph_regression_forward.9
= control target key start
LH: loop header
LB: loop body
LE: loop exit
PB: predicated region body
PF: predicated region fallthrough
CT: control target
= control target key end

     0   :  { %vm127_vm0 = vcmask 7168   ;;  %s329_s1 = inlined_call_operand.vmem [shape: f32[256,1], index: 1, kind: input, shape index: {}]   ;;  %s330_s0 = inlined_call_operand.vmem [shape: f32[8,256], index: 0, kind: input, shape index: {}]   ;;  %s331_s2 = inlined_call_operand.<no memory space> [shape: f32[1,1], index: 2, kind: input, shape index: {}]   ;;  %s332_s3 = inlined_call_operand.vmem [shape: f32[8,1], index: 3, kind: output, shape index: {}]  }
   0x1   :  { %v34_v0 = vld [vmem:[%s329_s1 + $0x80] sm:$0xff]  ;;  %v35_v1 = vld [vmem:[%s329_s1 + $0x88] sm:$0xff]  ;;  %v36_v5 = vld [vmem:[%s329_s1 + $0x90] sm:$0xff]  ;;  %v8_v50 = vstv %s331_s2 }
   0x2   :  { %v18_v2 = vld [vmem:[%s329_s1] sm:$0xff]  ;;  %v169_v3 = vpack.c.bf16 %v35_v1, %v34_v0  ;;  %v19_v4 = vld [vmem:[%s329_s1 + $0x8] sm:$0xff]  ;;  %v37_v6 = vld [vmem:[%s329_s1 + $0x98] sm:$0xff]  ;;  %9 = vst [vmem:[#allocation2] sm:$0x1] %v8_v50 }
   0x3   :  { %v171_v7 = vpack.c.bf16 %v19_v4, %v18_v2  ;;  %v173_v8 = vpack.c.bf16 %v37_v6, %v36_v5  ;;  %v20_v9 = vld [vmem:[%s329_s1 + $0x10] sm:$0xff]  ;;  %v21_v10 = vld [vmem:[%s329_s1 + $0x18] sm:$0xff]  ;;  %v38_v11 = vld [vmem:[%s329_s1 + $0xa0] sm:$0xff] }
   0x4   :  { %170 = vmatprep.subr.bf16.mxu0 %v169_v3  ;;  %v39_v12 = vld [vmem:[%s329_s1 + $0xa8] sm:$0xff]  ;;  %v175_v13 = vpack.c.bf16 %v21_v10, %v20_v9  ;;  %v22_v15 = vld [vmem:[%s329_s1 + $0x20] sm:$0xff]  ;;  %v40_v17 = vld [vmem:[%s329_s1 + $0xb0] sm:$0xff] }
   0x5   :  { %172 = vmatpush3.bf16.msra.mxu0 %v171_v7  ;;  %v177_v14 = vpack.c.bf16 %v39_v12, %v38_v11  ;;  %v23_v16 = vld [vmem:[%s329_s1 + $0x28] sm:$0xff]  ;;  %v41_v18 = vld [vmem:[%s329_s1 + $0xb8] sm:$0xff]  ;;  %v24_v21 = vld [vmem:[%s329_s1 + $0x30] sm:$0xff] }
   0x6   :  { %174 = vmatprep.subr.bf16.mxu0 %v173_v8  ;;  %v179_v19 = vpack.c.bf16 %v23_v16, %v22_v15  ;;  %v181_v20 = vpack.c.bf16 %v41_v18, %v40_v17  ;;  %v25_v22 = vld [vmem:[%s329_s1 + $0x38] sm:$0xff]  ;;  %v42_v23 = vld [vmem:[%s329_s1 + $0xc0] sm:$0xff]  ;;  %v43_v24 = vld [vmem:[%s329_s1 + $0xc8] sm:$0xff] }
   0x7   :  { %v17_v25 = vld [vmem:[%s330_s0 + $0x8] sm:$0xff]  ;;  %v183_v26 = vpack.c.bf16 %v25_v22, %v24_v21  ;;  %v185_v27 = vpack.c.bf16 %v43_v24, %v42_v23  ;;  %v26_v28 = vld [vmem:[%s329_s1 + $0x40] sm:$0xff]  ;;  %v44_v30 = vld [vmem:[%s329_s1 + $0xd0] sm:$0xff] }
   0x8   :  { %121 = vmatprep.mubr.f32.mxu0 %v17_v25  ;;  %v27_v29 = vld [vmem:[%s329_s1 + $0x48] sm:$0xff]  ;;  %v45_v31 = vld [vmem:[%s329_s1 + $0xd8] sm:$0xff]  ;;  %v28_v34 = vld [vmem:[%s329_s1 + $0x50] sm:$0xff] }
   0x9   :  { %176 = vmatpush3.bf16.msra.mxu0 %v175_v13  ;;  %v187_v32 = vpack.c.bf16 %v27_v29, %v26_v28  ;;  %v189_v33 = vpack.c.bf16 %v45_v31, %v44_v30  ;;  %v29_v35 = vld [vmem:[%s329_s1 + $0x58] sm:$0xff]  ;;  %v46_v36 = vld [vmem:[%s329_s1 + $0xe0] sm:$0xff]  ;;  %v47_v37 = vld [vmem:[%s329_s1 + $0xe8] sm:$0xff] }
   0xa   :  { %178 = vmatprep.subr.bf16.mxu0 %v177_v14  ;;  %v191_v38 = vpack.c.bf16 %v29_v35, %v28_v34  ;;  %v193_v39 = vpack.c.bf16 %v47_v37, %v46_v36  ;;  %v30_v40 = vld [vmem:[%s329_s1 + $0x60] sm:$0xff]  ;;  %v31_v41 = vld [vmem:[%s329_s1 + $0x68] sm:$0xff]  ;;  %v48_v42 = vld [vmem:[%s329_s1 + $0xf0] sm:$0xff] }
   0xb   :  { %v49_v43 = vld [vmem:[%s329_s1 + $0xf8] sm:$0xff]  ;;  %v195_v44 = vpack.c.bf16 %v31_v41, %v30_v40  ;;  %v32_v46 = vld [vmem:[%s329_s1 + $0x70] sm:$0xff]  ;;  %v16_v49 = vld [vmem:[%s330_s0] sm:$0xff] }
   0xc   :  { %v197_v45 = vpack.c.bf16 %v49_v43, %v48_v42  ;;  %v33_v47 = vld [vmem:[%s329_s1 + $0x78] sm:$0xff]  ;;  %v133_v52 = vld [vmem:[#allocation2] ss:$0 sm:$0xff] }
   0xd   :  { %180 = vmatpush3.bf16.msra.mxu0 %v179_v19  ;;  %v199_v48 = vpack.c.bf16 %v33_v47, %v32_v46 }
   0xe   :  { %182 = vmatprep.subr.bf16.mxu0 %v181_v20 }
  0x11   :  { %184 = vmatpush3.bf16.msra.mxu0 %v183_v26 }
  0x12   :  { %186 = vmatprep.subr.bf16.mxu0 %v185_v27 }
  0x15   :  { %188 = vmatpush3.bf16.msra.mxu0 %v187_v32 }
  0x16   :  { %190 = vmatprep.subr.bf16.mxu0 %v189_v33 }
  0x19   :  { %192 = vmatpush3.bf16.msra.mxu0 %v191_v38 }
  0x1a   :  { %194 = vmatprep.subr.bf16.mxu0 %v193_v39 }
  0x1d   :  { %196 = vmatpush3.bf16.msra.mxu0 %v195_v44 }
  0x1e   :  { %198 = vmatprep.subr.bf16.mxu0 %v197_v45 }
  0x21   :  { %200 = vmatpush3.bf16.msra.mxu0 %v199_v48 }
  0x24   :  { %122 = vmatmul.mubr.f32.vlgmr.msra.gmra.mrb[0].mxu0 %v16_v49 }
  0xf7   :  { %v166_v51 = vpop.f32.mrb[0].mxu0 }
  0xf8   :  { %v167_v53 = vpop.f32.mrb[1].mxu0 }
  0xf9   :  { %v168_v54 = vadd.f32 %v167_v53, %v166_v51 }
  0xfb   :  { %v124_v55 = vadd.f32 %v168_v54, %v133_v52 }
  0xfd   :  { %128 = vst.msk [vmem:[%s332_s3] sm:$0xff] %vm127_vm0, %v124_v55 }

// kernel: graph_regression_forward.6
= control target key start
LH: loop header
LB: loop body
LE: loop exit
PB: predicated region body
PF: predicated region fallthrough
CT: control target
= control target key end

     0   :  { %s2869_s1 = inlined_call_operand.vmem [shape: bf16[256,128], index: 1, kind: input, shape index: {}]   ;;  %s2870_s3 = inlined_call_operand.vmem [shape: bf16[128,128], index: 3, kind: input, shape index: {}]   ;;  %s2871_s2 = inlined_call_operand.vmem [shape: bf16[256,256], index: 2, kind: input, shape index: {}]   ;;  %s2872_s0 = inlined_call_operand.vmem [shape: bf16[256,128], index: 0, kind: input, shape index: {}]   ;;  %s2873_s5 = inlined_call_operand.vmem [shape: bf16[128,128], index: 5, kind: input, shape index: {}]   ;;  %s2874_s4 = inlined_call_operand.vmem [shape: f32[1,128], index: 4, kind: input, shape index: {}]   ;;  %s2875_s6 = inlined_call_operand.vmem [shape: bf16[256,128], index: 6, kind: output, shape index: {0}]   ;;  %s2876_s7 = inlined_call_operand.vmem [shape: bf16[256,128], index: 7, kind: output, shape index: {1}]  }
   0x1   :  { %v2306_v0 = vld [vmem:[%s2869_s1 + $0x40] sm:$0xff]   ;;  %v2309_v3 = vld [vmem:[%s2869_s1 + $0x48] sm:$0xff]   ;;  %v2312_v6 = vld [vmem:[%s2869_s1 + $0x50] sm:$0xff]  }
   0x2   :  { %v2307_v1 = vld [vmem:[%s2869_s1] sm:$0xff]   ;;  %2074 = vmatprep.subr.bf16.mxu1 %v2306_v0  ;;  %v2310_v4 = vld [vmem:[%s2869_s1 + $0x8] sm:$0xff]   ;;  %v2313_v7 = vld [vmem:[%s2869_s1 + $0x10] sm:$0xff]  }
   0x3   :  { %v2308_v2 = vld [vmem:[%s2870_s3] sm:$0xff]   ;;  %2075 = vmatpush3.bf16.msra.mxu1 %v2307_v1  ;;  %v2311_v5 = vld [vmem:[%s2870_s3 + $0x8] sm:$0xff]   ;;  %v2314_v8 = vld [vmem:[%s2870_s3 + $0x10] sm:$0xff]  }
   0x4   :  { %2210 = vmatprep.subr.bf16.mxu0 %v2308_v2  ;;  %2076 = vmatprep.subr.bf16.mxu1 %v2309_v3  ;;  %v2315_v9 = vld [vmem:[%s2869_s1 + $0x58] sm:$0xff]   ;;  %v2318_v12 = vld [vmem:[%s2869_s1 + $0x60] sm:$0xff]   ;;  %v2321_v15 = vld [vmem:[%s2869_s1 + $0x68] sm:$0xff]  }
   0x5   :  { %2211 = vmatpush3.bf16.msra.mxu0 %v2308_v2  ;;  %v2316_v10 = vld [vmem:[%s2869_s1 + $0x18] sm:$0xff]   ;;  %v2320_v13 = vld [vmem:[%s2870_s3 + $0x20] sm:$0xff]   ;;  %v2323_v16 = vld [vmem:[%s2870_s3 + $0x28] sm:$0xff]  }
   0x6   :  { %2212 = vmatprep.subr.bf16.mxu0 %v2311_v5  ;;  %v2317_v11 = vld [vmem:[%s2870_s3 + $0x18] sm:$0xff]   ;;  %v2319_v14 = vld [vmem:[%s2869_s1 + $0x20] sm:$0xff]   ;;  %v2322_v17 = vld [vmem:[%s2869_s1 + $0x28] sm:$0xff]  }
   0x7   :  { %2077 = vmatpush3.bf16.msra.mxu1 %v2310_v4  ;;  %v2324_v18 = vld [vmem:[%s2869_s1 + $0x70] sm:$0xff]   ;;  %v2327_v21 = vld [vmem:[%s2869_s1 + $0x78] sm:$0xff]   ;;  %v2332_v23 = vld [vmem:[%s2871_s2 + $0x4] ss:$8 sps:$4 sm:$0xff]  }
   0x8   :  { %2078 = vmatprep.subr.bf16.mxu1 %v2312_v6  ;;  %v2325_v19 = vld [vmem:[%s2869_s1 + $0x30] sm:$0xff]   ;;  %v2329_v22 = vld [vmem:[%s2870_s3 + $0x38] sm:$0xff]   ;;  %v2333_v24 = vld [vmem:[%s2872_s0] sm:$0xff]   ;;  %799 = vmatprep.mubr.bf16.mxu1 %v2332_v23 }
   0x9   :  { %2213 = vmatpush3.bf16.msra.mxu0 %v2311_v5  ;;  %v2326_v20 = vld [vmem:[%s2870_s3 + $0x30] sm:$0xff]   ;;  %v2328_v25 = vld [vmem:[%s2869_s1 + $0x38] sm:$0xff]   ;;  %2226 = vmatprep.mubr.bf16.mxu0 %v2333_v24  ;;  %v2330_v26 = vld [vmem:[%s2871_s2] ss:$8 sps:$4 sm:$0xff]  }
   0xa   :  { %2214 = vmatprep.subr.bf16.mxu0 %v2314_v8  ;;  %v2335_v27 = vld [vmem:[%s2871_s2 + $0x14] ss:$8 sps:$4 sm:$0xff]   ;;  %v2334_v28 = vld [vmem:[%s2872_s0 + $0x8] sm:$0xff]   ;;  %v2337_v30 = vld [vmem:[%s2871_s2 + $0x10] ss:$8 sps:$4 sm:$0xff]  }
   0xb   :  { %2079 = vmatpush3.bf16.msra.mxu1 %v2313_v7  ;;  %v2341_v29 = vld [vmem:[%s2872_s0 + $0x10] sm:$0xff]   ;;  %v2338_v31 = vld [vmem:[%s2871_s2 + $0x24] ss:$8 sps:$4 sm:$0xff]   ;;  %v2342_v32 = vld [vmem:[%s2872_s0 + $0x18] sm:$0xff]  }
   0xc   :  { %2080 = vmatprep.subr.bf16.mxu1 %v2315_v9  ;;  %v2349_v33 = vld [vmem:[%s2872_s0 + $0x20] sm:$0xff]   ;;  %v2343_v35 = vld [vmem:[%s2871_s2 + $0x34] ss:$8 sps:$4 sm:$0xff]   ;;  %v2350_v36 = vld [vmem:[%s2872_s0 + $0x28] sm:$0xff]  }
   0xd   :  { %2215 = vmatpush3.bf16.msra.mxu0 %v2314_v8  ;;  %v2340_v34 = vld [vmem:[%s2871_s2 + $0x20] ss:$8 sps:$4 sm:$0xff]   ;;  %v2357_v37 = vld [vmem:[%s2872_s0 + $0x30] sm:$0xff]   ;;  %v2346_v39 = vld [vmem:[%s2871_s2 + $0x44] ss:$8 sps:$4 sm:$0xff]  }
   0xe   :  { %2216 = vmatprep.subr.bf16.mxu0 %v2317_v11  ;;  %v2345_v38 = vld [vmem:[%s2871_s2 + $0x30] ss:$8 sps:$4 sm:$0xff]   ;;  %v2365_v41 = vld [vmem:[%s2872_s0 + $0x40] sm:$0xff]   ;;  %v2351_v43 = vld [vmem:[%s2871_s2 + $0x54] ss:$8 sps:$4 sm:$0xff]  }
   0xf   :  { %2081 = vmatpush3.bf16.msra.mxu1 %v2316_v10  ;;  %v2358_v40 = vld [vmem:[%s2872_s0 + $0x38] sm:$0xff]   ;;  %v2348_v42 = vld [vmem:[%s2871_s2 + $0x40] ss:$8 sps:$4 sm:$0xff]   ;;  %v2373_v46 = vld [vmem:[%s2872_s0 + $0x50] sm:$0xff]  }
  0x10   :  { %2082 = vmatprep.subr.bf16.mxu1 %v2318_v12  ;;  %v2366_v44 = vld [vmem:[%s2872_s0 + $0x48] sm:$0xff]   ;;  %v2394_v45 = vld [vmem:[%s2873_s5] sm:$0xff]   ;;  %v2396_v48 = vld [vmem:[%s2873_s5 + $0x10] sm:$0xff]  }
  0x11   :  { %2217 = vmatpush3.bf16.msra.mxu0 %v2317_v11  ;;  %v2395_v47 = vld [vmem:[%s2873_s5 + $0x8] sm:$0xff]   ;;  %v2353_v49 = vld [vmem:[%s2871_s2 + $0x50] ss:$8 sps:$4 sm:$0xff]   ;;  %v2381_v52 = vld [vmem:[%s2872_s0 + $0x60] sm:$0xff]  }
  0x12   :  { %2218 = vmatprep.subr.bf16.mxu0 %v2320_v13  ;;  %v2354_v50 = vld [vmem:[%s2871_s2 + $0x64] ss:$8 sps:$4 sm:$0xff]   ;;  %v2374_v51 = vld [vmem:[%s2872_s0 + $0x58] sm:$0xff]   ;;  %v2356_v53 = vld [vmem:[%s2871_s2 + $0x60] ss:$8 sps:$4 sm:$0xff]  }
  0x13   :  { %2083 = vmatpush3.bf16.msra.mxu1 %v2319_v14  ;;  %v2359_v54 = vld [vmem:[%s2871_s2 + $0x74] ss:$8 sps:$4 sm:$0xff]   ;;  %v2382_v55 = vld [vmem:[%s2872_s0 + $0x68] sm:$0xff]   ;;  %v2361_v57 = vld [vmem:[%s2871_s2 + $0x70] ss:$8 sps:$4 sm:$0xff]  }
  0x14   :  { %2084 = vmatprep.subr.bf16.mxu1 %v2321_v15  ;;  %v2389_v56 = vld [vmem:[%s2872_s0 + $0x70] sm:$0xff]   ;;  %v2362_v58 = vld [vmem:[%s2871_s2 + $0x84] ss:$8 sps:$4 sm:$0xff]   ;;  %v2390_v59 = vld [vmem:[%s2872_s0 + $0x78] sm:$0xff]  }
  0x15   :  { %2219 = vmatpush3.bf16.msra.mxu0 %v2320_v13  ;;  %v2364_v60 = vld [vmem:[%s2871_s2 + $0x80] ss:$8 sps:$4 sm:$0xff]   ;;  %v2367_v61 = vld [vmem:[%s2871_s2 + $0x94] ss:$8 sps:$4 sm:$0xff]   ;;  %v2369_v62 = vld [vmem:[%s2871_s2 + $0x90] ss:$8 sps:$4 sm:$0xff]  }
  0x16   :  { %2220 = vmatprep.subr.bf16.mxu0 %v2323_v16  ;;  %v2370_v63 = vld [vmem:[%s2871_s2 + $0xa4] ss:$8 sps:$4 sm:$0xff]   ;;  %v2372_v0 = vld [vmem:[%s2871_s2 + $0xa0] ss:$8 sps:$4 sm:$0xff]   ;;  %v2375_v1 = vld [vmem:[%s2871_s2 + $0xb4] ss:$8 sps:$4 sm:$0xff]  }
  0x17   :  { %2085 = vmatpush3.bf16.msra.mxu1 %v2322_v17  ;;  %v2397_v2 = vld [vmem:[%s2873_s5 + $0x18] sm:$0xff]   ;;  %v2378_v4 = vld [vmem:[%s2871_s2 + $0xc4] ss:$8 sps:$4 sm:$0xff]   ;;  %v2380_v7 = vld [vmem:[%s2871_s2 + $0xc0] ss:$8 sps:$4 sm:$0xff]  }
  0x18   :  { %2086 = vmatprep.subr.bf16.mxu1 %v2324_v18  ;;  %v2377_v3 = vld [vmem:[%s2871_s2 + $0xb0] ss:$8 sps:$4 sm:$0xff]   ;;  %v2398_v5 = vld [vmem:[%s2873_s5 + $0x20] sm:$0xff]   ;;  %v2399_v6 = vld [vmem:[%s2873_s5 + $0x28] sm:$0xff]  }
  0x19   :  { %2221 = vmatpush3.bf16.msra.mxu0 %v2323_v16  ;;  %v2383_v8 = vld [vmem:[%s2871_s2 + $0xd4] ss:$8 sps:$4 sm:$0xff]   ;;  %v2385_v11 = vld [vmem:[%s2871_s2 + $0xd0] ss:$8 sps:$4 sm:$0xff]   ;;  %v2386_v12 = vld [vmem:[%s2871_s2 + $0xe4] ss:$8 sps:$4 sm:$0xff]  }
  0x1a   :  { %2222 = vmatprep.subr.bf16.mxu0 %v2326_v20  ;;  %v2400_v9 = vld [vmem:[%s2873_s5 + $0x30] sm:$0xff]   ;;  %v2401_v10 = vld [vmem:[%s2873_s5 + $0x38] sm:$0xff]   ;;  %v2388_v13 = vld [vmem:[%s2871_s2 + $0xe0] ss:$8 sps:$4 sm:$0xff]  }
  0x1b   :  { %2087 = vmatpush3.bf16.msra.mxu1 %v2325_v19  ;;  %v2391_v14 = vld [vmem:[%s2871_s2 + $0xf4] ss:$8 sps:$4 sm:$0xff]   ;;  %v2393_v15 = vld [vmem:[%s2871_s2 + $0xf0] ss:$8 sps:$4 sm:$0xff]  }
  0x1c   :  { %2088 = vmatprep.subr.bf16.mxu1 %v2327_v21 }
  0x1d   :  { %2223 = vmatpush3.bf16.msra.mxu0 %v2326_v20 }
  0x1e   :  { %2224 = vmatprep.subr.bf16.mxu0 %v2329_v22 }
  0x1f   :  { %2089 = vmatpush3.bf16.msra.mxu1 %v2328_v25 }
  0x21   :  { %2225 = vmatpush3.bf16.msra.mxu0 %v2329_v22  ;;  %v2685_v22 = vld [vmem:[%s2874_s4] ss:$0 sm:$0xff] }
  0x22   :  { %800 = vmatmul.mubr.bf16.vlgmr.msra.gmra.mrb[0].mxu1 %v2330_v26  ;;  %2258 = vmatprep.subr.bf16.mxu0 %v2394_v45 }
  0x23   :  { %807 = vmatprep.mubr.bf16.mxu1 %v2335_v27 }
  0x24   :  { %2227 = vmatmul.mubr.bf16.vlgmr.msra.gmra.mrb[0].mxu0 %v2334_v28 }
  0x25   :  { %2230 = vmatprep.mubr.bf16.mxu0 %v2341_v29  ;;  %2259 = vmatpush3.bf16.msra.mxu0 %v2394_v45 }
  0x26   :  { %2260 = vmatprep.subr.bf16.mxu0 %v2395_v47 }
  0x29   :  { %2261 = vmatpush3.bf16.msra.mxu0 %v2395_v47 }
  0x2a   :  { %808 = vmatmul.mubr.bf16.gmra.mrb[4].mxu1 %v2337_v30  ;;  %2262 = vmatprep.subr.bf16.mxu0 %v2396_v48 }
  0x2b   :  { %815 = vmatprep.mubr.bf16.mxu1 %v2338_v31 }
  0x2c   :  { %2231 = vmatmul.mubr.bf16.gmra.mrb[4].mxu0 %v2342_v32 }
  0x2d   :  { %2234 = vmatprep.mubr.bf16.mxu0 %v2349_v33  ;;  %2263 = vmatpush3.bf16.msra.mxu0 %v2396_v48 }
  0x2e   :  { %2264 = vmatprep.subr.bf16.mxu0 %v2397_v2 }
  0x31   :  { %2265 = vmatpush3.bf16.msra.mxu0 %v2397_v2 }
  0x32   :  { %816 = vmatmul.mubr.bf16.gmra.mrb[8].mxu1 %v2340_v34  ;;  %2266 = vmatprep.subr.bf16.mxu0 %v2398_v5 }
  0x33   :  { %823 = vmatprep.mubr.bf16.mxu1 %v2343_v35 }
  0x34   :  { %2235 = vmatmul.mubr.bf16.gmra.mrb[8].mxu0 %v2350_v36 }
  0x35   :  { %2238 = vmatprep.mubr.bf16.mxu0 %v2357_v37  ;;  %2267 = vmatpush3.bf16.msra.mxu0 %v2398_v5 }
  0x36   :  { %2268 = vmatprep.subr.bf16.mxu0 %v2399_v6 }
  0x39   :  { %2269 = vmatpush3.bf16.msra.mxu0 %v2399_v6 }
  0x3a   :  { %824 = vmatmul.mubr.bf16.gmra.mrb[12].mxu1 %v2345_v38  ;;  %2270 = vmatprep.subr.bf16.mxu0 %v2400_v9 }
  0x3b   :  { %831 = vmatprep.mubr.bf16.mxu1 %v2346_v39 }
  0x3c   :  { %2239 = vmatmul.mubr.bf16.gmra.mrb[12].mxu0 %v2358_v40 }
  0x3d   :  { %2242 = vmatprep.mubr.bf16.mxu0 %v2365_v41  ;;  %2271 = vmatpush3.bf16.msra.mxu0 %v2400_v9 }
  0x3e   :  { %2272 = vmatprep.subr.bf16.mxu0 %v2401_v10 }
  0x41   :  { %2273 = vmatpush3.bf16.msra.mxu0 %v2401_v10 }
  0x42   :  { %832 = vmatmul.mubr.bf16.gmra.mrb[16].mxu1 %v2348_v42 }
  0x43   :  { %839 = vmatprep.mubr.bf16.mxu1 %v2351_v43 }
  0x44   :  { %2243 = vmatmul.mubr.bf16.gmra.mrb[16].mxu0 %v2366_v44 }
  0x45   :  { %2246 = vmatprep.mubr.bf16.mxu0 %v2373_v46 }
  0x4a   :  { %840 = vmatmul.mubr.bf16.gmra.mrb[20].mxu1 %v2353_v49 }
  0x4b   :  { %847 = vmatprep.mubr.bf16.mxu1 %v2354_v50 }
  0x4c   :  { %2247 = vmatmul.mubr.bf16.gmra.mrb[20].mxu0 %v2374_v51 }
  0x4d   :  { %2250 = vmatprep.mubr.bf16.mxu0 %v2381_v52 }
  0x52   :  { %848 = vmatmul.mubr.bf16.gmra.mrb[24].mxu1 %v2356_v53 }
  0x53   :  { %855 = vmatprep.mubr.bf16.mxu1 %v2359_v54 }
  0x54   :  { %2251 = vmatmul.mubr.bf16.gmra.mrb[24].mxu0 %v2382_v55 }
  0x55   :  { %2254 = vmatprep.mubr.bf16.mxu0 %v2389_v56 }
  0x5a   :  { %856 = vmatmul.mubr.bf16.gmra.mrb[28].mxu1 %v2361_v57 }
  0x5b   :  { %863 = vmatprep.mubr.bf16.mxu1 %v2362_v58 }
  0x5c   :  { %2255 = vmatmul.mubr.bf16.gmra.mrb[28].mxu0 %v2390_v59 }
  0x62   :  { %864 = vmatmul.mubr.bf16.gmra.mrb[32].mxu1 %v2364_v60 }
  0x63   :  { %871 = vmatprep.mubr.bf16.mxu1 %v2367_v61 }
  0x6a   :  { %872 = vmatmul.mubr.bf16.gmra.mrb[36].mxu1 %v2369_v62 }
  0x6b   :  { %879 = vmatprep.mubr.bf16.mxu1 %v2370_v63 }
  0x72   :  { %880 = vmatmul.mubr.bf16.gmra.mrb[40].mxu1 %v2372_v0 }
  0x73   :  { %887 = vmatprep.mubr.bf16.mxu1 %v2375_v1 }
  0x7a   :  { %888 = vmatmul.mubr.bf16.gmra.mrb[44].mxu1 %v2377_v3 }
  0x7b   :  { %895 = vmatprep.mubr.bf16.mxu1 %v2378_v4 }
  0x82   :  { %896 = vmatmul.mubr.bf16.gmra.mrb[48].mxu1 %v2380_v7 }
  0x83   :  { %903 = vmatprep.mubr.bf16.mxu1 %v2383_v8 }
  0x8a   :  { %904 = vmatmul.mubr.bf16.gmra.mrb[52].mxu1 %v2385_v11 }
  0x8b   :  { %911 = vmatprep.mubr.bf16.mxu1 %v2386_v12 }
  0x92   :  { %912 = vmatmul.mubr.bf16.gmra.mrb[56].mxu1 %v2388_v13 }
  0x93   :  { %919 = vmatprep.mubr.bf16.mxu1 %v2391_v14 }
  0x9a   :  { %920 = vmatmul.mubr.bf16.gmra.mrb[60].mxu1 %v2393_v15 }
  0xf5   :  { %v2090_v16 = vpop.f32.mrb[0].mxu1 }
  0xf6   :  { %v2091_v17 = vpop.f32.mrb[1].mxu1 }
  0xf7   :  { %v2092_v18 = vadd.f32 %v2091_v17, %v2090_v16  ;;  %v2228_v19 = vpop.f32.mrb[0].mxu0  ;;  %v2093_v20 = vpop.f32.mrb[2].mxu1 }
  0xf8   :  { %v256_v21 = vpop.f32.mrb[1].mxu0  ;;  %v2094_v23 = vpop.f32.mrb[3].mxu1 }
  0xf9   :  { %v928_v24 = vadd.f32 %v2092_v18, %v256_v21  ;;  %v2095_v25 = vadd.f32 %v2094_v23, %v2093_v20  ;;  %v2229_v26 = vpop.f32.mrb[2].mxu0 }
  0xfa   :  { %v259_v27 = vpop.f32.mrb[3].mxu0 }
  0xfb   :  { %v1034_v28 = vadd.f32 %v2685_v22, %v928_v24  ;;  %v929_v29 = vadd.f32 %v2095_v25, %v259_v27 }
  0xfd   :  { %v1035_v30 = vadd.f32 %v2685_v22, %v929_v29  ;;  %v2096_v31 = vpop.f32.mrb[4].mxu1  ;;  %v1066_v33 = vmax.f32 %v1034_v28, 0.0 }
  0xfe   :  { %v2097_v32 = vpop.f32.mrb[5].mxu1 }
  0xff   :  { %v1067_v34 = vmax.f32 %v1035_v30, 0.0  ;;  %v2098_v35 = vadd.f32 %v2097_v32, %v2096_v31  ;;  %v2099_v36 = vpop.f32.mrb[6].mxu1  ;;  %v2232_v37 = vpop.f32.mrb[4].mxu0 }
 0x100   :  { %v2100_v38 = vpop.f32.mrb[7].mxu1  ;;  %v272_v39 = vpop.f32.mrb[5].mxu0 }
 0x101   :  { %v930_v40 = vadd.f32 %v2228_v19, %v2098_v35  ;;  %v2101_v41 = vadd.f32 %v2100_v38, %v2099_v36  ;;  %v1098_v42 = vpack.c.bf16 %v1067_v34, %v1066_v33  ;;  %v2233_v43 = vpop.f32.mrb[6].mxu0 }
 0x102   :  { %v275_v44 = vpop.f32.mrb[7].mxu0 }
 0x103   :  { %v1036_v45 = vadd.f32 %v2685_v22, %v930_v40  ;;  %v931_v46 = vadd.f32 %v2229_v26, %v2101_v41  ;;  %1864 = vst [vmem:[%s2875_s6] sm:$0xff] %v1098_v42   ;;  %2274 = vmatprep.mubr.bf16.mxu0 %v1098_v42 }
 0x105   :  { %v1037_v47 = vadd.f32 %v2685_v22, %v931_v46  ;;  %v2102_v48 = vpop.f32.mrb[8].mxu1  ;;  %v1068_v50 = vmax.f32 %v1036_v45, 0.0 }
 0x106   :  { %v2103_v49 = vpop.f32.mrb[9].mxu1 }
 0x107   :  { %v1069_v51 = vmax.f32 %v1037_v47, 0.0  ;;  %v2104_v52 = vadd.f32 %v2103_v49, %v2102_v48  ;;  %v2105_v53 = vpop.f32.mrb[10].mxu1  ;;  %v2236_v54 = vpop.f32.mrb[8].mxu0 }
 0x108   :  { %v2106_v55 = vpop.f32.mrb[11].mxu1  ;;  %v288_v56 = vpop.f32.mrb[9].mxu0 }
 0x109   :  { %v1099_v57 = vpack.c.bf16 %v1069_v51, %v1068_v50  ;;  %v932_v58 = vadd.f32 %v2104_v52, %v272_v39  ;;  %v2107_v59 = vadd.f32 %v2106_v55, %v2105_v53  ;;  %v2237_v60 = vpop.f32.mrb[10].mxu0 }
 0x10a   :  { %v291_v61 = vpop.f32.mrb[11].mxu0 }
 0x10b   :  { %2020 = vst [vmem:[%s2875_s6 + $0x8] sm:$0xff] %v1099_v57   ;;  %v1038_v62 = vadd.f32 %v2685_v22, %v932_v58  ;;  %v933_v63 = vadd.f32 %v2107_v59, %v275_v44  ;;  %2275 = vmatmul.mubr.bf16.vlgmr.msra.gmra.mrb[32].mxu0 %v1099_v57 }
 0x10d   :  { %v1039_v0 = vadd.f32 %v2685_v22, %v933_v63  ;;  %v2108_v1 = vpop.f32.mrb[12].mxu1  ;;  %v1070_v3 = vmax.f32 %v1038_v62, 0.0 }
 0x10e   :  { %v2109_v2 = vpop.f32.mrb[13].mxu1 }
 0x10f   :  { %v1071_v4 = vmax.f32 %v1039_v0, 0.0  ;;  %v2110_v5 = vadd.f32 %v2109_v2, %v2108_v1  ;;  %v2111_v6 = vpop.f32.mrb[14].mxu1  ;;  %v2699_v7 = vpop.f32.mrb[12].mxu0 }
 0x110   :  { %v2112_v8 = vpop.f32.mrb[15].mxu1  ;;  %v304_v9 = vpop.f32.mrb[13].mxu0 }
 0x111   :  { %v934_v10 = vadd.f32 %v2232_v37, %v2110_v5  ;;  %v2113_v11 = vadd.f32 %v2112_v8, %v2111_v6  ;;  %v1100_v12 = vpack.c.bf16 %v1071_v4, %v1070_v3  ;;  %v2701_v13 = vpop.f32.mrb[14].mxu0 }
 0x112   :  { %v307_v14 = vpop.f32.mrb[15].mxu0 }
 0x113   :  { %v1040_v15 = vadd.f32 %v2685_v22, %v934_v10  ;;  %v935_v16 = vadd.f32 %v2233_v43, %v2113_v11  ;;  %2021 = vst [vmem:[%s2875_s6 + $0x10] sm:$0xff] %v1100_v12   ;;  %2278 = vmatprep.mubr.bf16.mxu0 %v1100_v12 }
 0x115   :  { %v1041_v17 = vadd.f32 %v2685_v22, %v935_v16  ;;  %v2114_v18 = vpop.f32.mrb[16].mxu1  ;;  %v1072_v20 = vmax.f32 %v1040_v15, 0.0 }
 0x116   :  { %v2115_v19 = vpop.f32.mrb[17].mxu1 }
 0x117   :  { %v1073_v21 = vmax.f32 %v1041_v17, 0.0  ;;  %v2116_v23 = vadd.f32 %v2115_v19, %v2114_v18  ;;  %v2117_v24 = vpop.f32.mrb[18].mxu1  ;;  %v2708_v25 = vpop.f32.mrb[16].mxu0 }
 0x118   :  { %v2118_v26 = vpop.f32.mrb[19].mxu1  ;;  %v2710_v27 = vpop.f32.mrb[17].mxu0 }
 0x119   :  { %v936_v28 = vadd.f32 %v2116_v23, %v288_v56  ;;  %v2119_v29 = vadd.f32 %v2118_v26, %v2117_v24  ;;  %v1101_v30 = vpack.c.bf16 %v1073_v21, %v1072_v20  ;;  %v2712_v31 = vpop.f32.mrb[18].mxu0 }
 0x11a   :  { %v2714_v32 = vpop.f32.mrb[19].mxu0 }
 0x11b   :  { %v1042_v33 = vadd.f32 %v2685_v22, %v936_v28  ;;  %v937_v34 = vadd.f32 %v2119_v29, %v291_v61  ;;  %2022 = vst [vmem:[%s2875_s6 + $0x18] sm:$0xff] %v1101_v30   ;;  %2279 = vmatmul.mubr.bf16.gmra.mrb[36].mxu0 %v1101_v30 }
 0x11d   :  { %v1043_v35 = vadd.f32 %v2685_v22, %v937_v34  ;;  %v2120_v36 = vpop.f32.mrb[20].mxu1  ;;  %v1074_v38 = vmax.f32 %v1042_v33, 0.0 }
 0x11e   :  { %v2121_v37 = vpop.f32.mrb[21].mxu1 }
 0x11f   :  { %v1075_v39 = vmax.f32 %v1043_v35, 0.0  ;;  %v2122_v40 = vadd.f32 %v2121_v37, %v2120_v36  ;;  %v2123_v41 = vpop.f32.mrb[22].mxu1  ;;  %v2721_v42 = vpop.f32.mrb[20].mxu0 }
 0x120   :  { %v2124_v43 = vpop.f32.mrb[23].mxu1  ;;  %v2723_v44 = vpop.f32.mrb[21].mxu0 }
 0x121   :  { %v938_v45 = vadd.f32 %v2236_v54, %v2122_v40  ;;  %v2125_v46 = vadd.f32 %v2124_v43, %v2123_v41  ;;  %v1102_v47 = vpack.c.bf16 %v1075_v39, %v1074_v38  ;;  %v2725_v48 = vpop.f32.mrb[22].mxu0 }
 0x122   :  { %v2727_v49 = vpop.f32.mrb[23].mxu0 }
 0x123   :  { %v1044_v50 = vadd.f32 %v2685_v22, %v938_v45  ;;  %v939_v51 = vadd.f32 %v2237_v60, %v2125_v46  ;;  %2023 = vst [vmem:[%s2875_s6 + $0x20] sm:$0xff] %v1102_v47   ;;  %2282 = vmatprep.mubr.bf16.mxu0 %v1102_v47 }
 0x125   :  { %v1045_v52 = vadd.f32 %v2685_v22, %v939_v51  ;;  %v2126_v53 = vpop.f32.mrb[24].mxu1  ;;  %v1076_v56 = vmax.f32 %v1044_v50, 0.0 }
 0x126   :  { %v2127_v55 = vpop.f32.mrb[25].mxu1 }
 0x127   :  { %v1077_v54 = vmax.f32 %v1045_v52, 0.0  ;;  %v2128_v57 = vadd.f32 %v2127_v55, %v2126_v53  ;;  %v2129_v58 = vpop.f32.mrb[26].mxu1  ;;  %v2734_v59 = vpop.f32.mrb[24].mxu0 }
 0x128   :  { %v2130_v61 = vpop.f32.mrb[27].mxu1  ;;  %v2736_v62 = vpop.f32.mrb[25].mxu0 }
 0x129   :  { %v940_v63 = vadd.f32 %v2128_v57, %v304_v9  ;;  %v2131_v60 = vadd.f32 %v2130_v61, %v2129_v58  ;;  %v1103_v0 = vpack.c.bf16 %v1077_v54, %v1076_v56  ;;  %v2738_v1 = vpop.f32.mrb[26].mxu0 }
 0x12a   :  { %v2740_v2 = vpop.f32.mrb[27].mxu0 }
 0x12b   :  { %v1046_v3 = vadd.f32 %v2685_v22, %v940_v63  ;;  %v941_v4 = vadd.f32 %v2131_v60, %v307_v14  ;;  %2024 = vst [vmem:[%s2875_s6 + $0x28] sm:$0xff] %v1103_v0   ;;  %2283 = vmatmul.mubr.bf16.gmra.mrb[40].mxu0 %v1103_v0 }
 0x12d   :  { %v1047_v5 = vadd.f32 %v2685_v22, %v941_v4  ;;  %v2132_v6 = vpop.f32.mrb[28].mxu1  ;;  %v1078_v10 = vmax.f32 %v1046_v3, 0.0 }
 0x12e   :  { %v2133_v8 = vpop.f32.mrb[29].mxu1 }
 0x12f   :  { %v1079_v9 = vmax.f32 %v1047_v5, 0.0  ;;  %v2134_v11 = vadd.f32 %v2133_v8, %v2132_v6  ;;  %v2135_v12 = vpop.f32.mrb[30].mxu1  ;;  %v2747_v15 = vpop.f32.mrb[28].mxu0 }
 0x130   :  { %v2136_v16 = vpop.f32.mrb[31].mxu1  ;;  %v2749_v17 = vpop.f32.mrb[29].mxu0 }
 0x131   :  { %v942_v14 = vadd.f32 %v2699_v7, %v2134_v11  ;;  %v2137_v18 = vadd.f32 %v2136_v16, %v2135_v12  ;;  %v1104_v19 = vpack.c.bf16 %v1079_v9, %v1078_v10  ;;  %v2752_v20 = vpop.f32.mrb[30].mxu0 }
 0x132   :  { %v2754_v21 = vpop.f32.mrb[31].mxu0 }
 0x133   :  { %v1048_v23 = vadd.f32 %v2685_v22, %v942_v14  ;;  %v943_v24 = vadd.f32 %v2701_v13, %v2137_v18  ;;  %2025 = vst [vmem:[%s2875_s6 + $0x30] sm:$0xff] %v1104_v19   ;;  %2286 = vmatprep.mubr.bf16.mxu0 %v1104_v19 }
 0x135   :  { %v1049_v26 = vadd.f32 %v2685_v22, %v943_v24  ;;  %v2138_v28 = vpop.f32.mrb[32].mxu1  ;;  %v1080_v7 = vmax.f32 %v1048_v23, 0.0 }
 0x136   :  { %v2139_v29 = vpop.f32.mrb[33].mxu1 }
 0x137   :  { %v1081_v30 = vmax.f32 %v1049_v26, 0.0  ;;  %v2140_v33 = vadd.f32 %v2139_v29, %v2138_v28  ;;  %v2141_v34 = vpop.f32.mrb[34].mxu1 }
 0x138   :  { %v2142_v35 = vpop.f32.mrb[35].mxu1 }
 0x139   :  { %v944_v36 = vadd.f32 %v2140_v33, %v2710_v27  ;;  %v2143_v37 = vadd.f32 %v2142_v35, %v2141_v34  ;;  %v1105_v38 = vpack.c.bf16 %v1081_v30, %v1080_v7 }
 0x13b   :  { %v1050_v13 = vadd.f32 %v2685_v22, %v944_v36  ;;  %v945_v39 = vadd.f32 %v2143_v37, %v2714_v32  ;;  %2026 = vst [vmem:[%s2875_s6 + $0x38] sm:$0xff] %v1105_v38   ;;  %2287 = vmatmul.mubr.bf16.gmra.mrb[44].mxu0 %v1105_v38 }
 0x13d   :  { %v1051_v40 = vadd.f32 %v2685_v22, %v945_v39  ;;  %v2144_v41 = vpop.f32.mrb[36].mxu1  ;;  %v1082_v45 = vmax.f32 %v1050_v13, 0.0 }
 0x13e   :  { %v2145_v43 = vpop.f32.mrb[37].mxu1 }
 0x13f   :  { %v1083_v46 = vmax.f32 %v1051_v40, 0.0  ;;  %v2146_v47 = vadd.f32 %v2145_v43, %v2144_v41  ;;  %v2147_v50 = vpop.f32.mrb[38].mxu1 }
 0x140   :  { %v2148_v27 = vpop.f32.mrb[39].mxu1 }
 0x141   :  { %v946_v51 = vadd.f32 %v2708_v25, %v2146_v47  ;;  %v2149_v52 = vadd.f32 %v2148_v27, %v2147_v50  ;;  %v1106_v53 = vpack.c.bf16 %v1083_v46, %v1082_v45 }
 0x143   :  { %v1052_v32 = vadd.f32 %v2685_v22, %v946_v51  ;;  %v947_v55 = vadd.f32 %v2712_v31, %v2149_v52  ;;  %2027 = vst [vmem:[%s2875_s6 + $0x40] sm:$0xff] %v1106_v53   ;;  %2290 = vmatprep.mubr.bf16.mxu0 %v1106_v53 }
 0x145   :  { %v1053_v56 = vadd.f32 %v2685_v22, %v947_v55  ;;  %v2150_v54 = vpop.f32.mrb[40].mxu1  ;;  %v1084_v58 = vmax.f32 %v1052_v32, 0.0 }
 0x146   :  { %v2151_v57 = vpop.f32.mrb[41].mxu1 }
 0x147   :  { %v1085_v61 = vmax.f32 %v1053_v56, 0.0  ;;  %v2152_v63 = vadd.f32 %v2151_v57, %v2150_v54  ;;  %v2153_v60 = vpop.f32.mrb[42].mxu1 }
 0x148   :  { %v2154_v25 = vpop.f32.mrb[43].mxu1 }
 0x149   :  { %v948_v0 = vadd.f32 %v2152_v63, %v2723_v44  ;;  %v2155_v3 = vadd.f32 %v2154_v25, %v2153_v60  ;;  %v1107_v4 = vpack.c.bf16 %v1085_v61, %v1084_v58 }
 0x14b   :  { %v1054_v31 = vadd.f32 %v2685_v22, %v948_v0  ;;  %v949_v5 = vadd.f32 %v2155_v3, %v2727_v49  ;;  %2028 = vst [vmem:[%s2875_s6 + $0x48] sm:$0xff] %v1107_v4   ;;  %2291 = vmatmul.mubr.bf16.gmra.mrb[48].mxu0 %v1107_v4 }
 0x14d   :  { %v1055_v6 = vadd.f32 %v2685_v22, %v949_v5  ;;  %v2156_v8 = vpop.f32.mrb[44].mxu1  ;;  %v1086_v9 = vmax.f32 %v1054_v31, 0.0 }
 0x14e   :  { %v2157_v10 = vpop.f32.mrb[45].mxu1 }
 0x14f   :  { %v1087_v11 = vmax.f32 %v1055_v6, 0.0  ;;  %v2158_v12 = vadd.f32 %v2157_v10, %v2156_v8  ;;  %v2159_v16 = vpop.f32.mrb[46].mxu1 }
 0x150   :  { %v2160_v44 = vpop.f32.mrb[47].mxu1 }
 0x151   :  { %v950_v14 = vadd.f32 %v2721_v42, %v2158_v12  ;;  %v2161_v18 = vadd.f32 %v2160_v44, %v2159_v16  ;;  %v1108_v19 = vpack.c.bf16 %v1087_v11, %v1086_v9 }
 0x153   :  { %v1056_v49 = vadd.f32 %v2685_v22, %v950_v14  ;;  %v951_v23 = vadd.f32 %v2725_v48, %v2161_v18  ;;  %2029 = vst [vmem:[%s2875_s6 + $0x50] sm:$0xff] %v1108_v19   ;;  %2294 = vmatprep.mubr.bf16.mxu0 %v1108_v19 }
 0x155   :  { %v1057_v24 = vadd.f32 %v2685_v22, %v951_v23  ;;  %v2162_v26 = vpop.f32.mrb[48].mxu1  ;;  %v1088_v29 = vmax.f32 %v1056_v49, 0.0 }
 0x156   :  { %v2163_v28 = vpop.f32.mrb[49].mxu1 }
 0x157   :  { %v1089_v7 = vmax.f32 %v1057_v24, 0.0  ;;  %v2164_v30 = vadd.f32 %v2163_v28, %v2162_v26  ;;  %v2165_v33 = vpop.f32.mrb[50].mxu1 }
 0x158   :  { %v2166_v42 = vpop.f32.mrb[51].mxu1 }
 0x159   :  { %v952_v34 = vadd.f32 %v2164_v30, %v2736_v62  ;;  %v2167_v35 = vadd.f32 %v2166_v42, %v2165_v33  ;;  %v1109_v36 = vpack.c.bf16 %v1089_v7, %v1088_v29 }
 0x15b   :  { %v1058_v48 = vadd.f32 %v2685_v22, %v952_v34  ;;  %v953_v37 = vadd.f32 %v2167_v35, %v2740_v2  ;;  %2030 = vst [vmem:[%s2875_s6 + $0x58] sm:$0xff] %v1109_v36   ;;  %2295 = vmatmul.mubr.bf16.gmra.mrb[52].mxu0 %v1109_v36 }
 0x15d   :  { %v1059_v38 = vadd.f32 %v2685_v22, %v953_v37  ;;  %v2168_v13 = vpop.f32.mrb[52].mxu1  ;;  %v1090_v40 = vmax.f32 %v1058_v48, 0.0 }
 0x15e   :  { %v2169_v39 = vpop.f32.mrb[53].mxu1 }
 0x15f   :  { %v1091_v41 = vmax.f32 %v1059_v38, 0.0  ;;  %v2170_v43 = vadd.f32 %v2169_v39, %v2168_v13  ;;  %v2171_v45 = vpop.f32.mrb[54].mxu1 }
 0x160   :  { %v2172_v62 = vpop.f32.mrb[55].mxu1 }
 0x161   :  { %v954_v46 = vadd.f32 %v2734_v59, %v2170_v43  ;;  %v2173_v47 = vadd.f32 %v2172_v62, %v2171_v45  ;;  %v1110_v50 = vpack.c.bf16 %v1091_v41, %v1090_v40 }
 0x163   :  { %v1060_v2 = vadd.f32 %v2685_v22, %v954_v46  ;;  %v955_v27 = vadd.f32 %v2738_v1, %v2173_v47  ;;  %2031 = vst [vmem:[%s2875_s6 + $0x60] sm:$0xff] %v1110_v50   ;;  %2298 = vmatprep.mubr.bf16.mxu0 %v1110_v50 }
 0x165   :  { %v1061_v51 = vadd.f32 %v2685_v22, %v955_v27  ;;  %v2174_v52 = vpop.f32.mrb[56].mxu1  ;;  %v1092_v32 = vmax.f32 %v1060_v2, 0.0 }
 0x166   :  { %v2175_v53 = vpop.f32.mrb[57].mxu1 }
 0x167   :  { %v1093_v55 = vmax.f32 %v1061_v51, 0.0  ;;  %v2176_v56 = vadd.f32 %v2175_v53, %v2174_v52  ;;  %v2177_v54 = vpop.f32.mrb[58].mxu1 }
 0x168   :  { %v2178_v59 = vpop.f32.mrb[59].mxu1 }
 0x169   :  { %v956_v57 = vadd.f32 %v2176_v56, %v2749_v17  ;;  %v2179_v58 = vadd.f32 %v2178_v59, %v2177_v54  ;;  %v1111_v61 = vpack.c.bf16 %v1093_v55, %v1092_v32 }
 0x16b   :  { %v1062_v1 = vadd.f32 %v2685_v22, %v956_v57  ;;  %v957_v63 = vadd.f32 %v2179_v58, %v2754_v21  ;;  %2032 = vst [vmem:[%s2875_s6 + $0x68] sm:$0xff] %v1111_v61   ;;  %2299 = vmatmul.mubr.bf16.gmra.mrb[56].mxu0 %v1111_v61 }
 0x16d   :  { %v1063_v60 = vadd.f32 %v2685_v22, %v957_v63  ;;  %v2180_v25 = vpop.f32.mrb[60].mxu1  ;;  %v1094_v3 = vmax.f32 %v1062_v1, 0.0 }
 0x16e   :  { %v2181_v0 = vpop.f32.mrb[61].mxu1 }
 0x16f   :  { %v1095_v4 = vmax.f32 %v1063_v60, 0.0  ;;  %v2182_v31 = vadd.f32 %v2181_v0, %v2180_v25  ;;  %v2183_v5 = vpop.f32.mrb[62].mxu1 }
 0x170   :  { %v2184_v17 = vpop.f32.mrb[63].mxu1 }
 0x171   :  { %v958_v6 = vadd.f32 %v2747_v15, %v2182_v31  ;;  %v2185_v8 = vadd.f32 %v2184_v17, %v2183_v5  ;;  %v1112_v10 = vpack.c.bf16 %v1095_v4, %v1094_v3 }
 0x173   :  { %v1064_v21 = vadd.f32 %v2685_v22, %v958_v6  ;;  %v959_v9 = vadd.f32 %v2752_v20, %v2185_v8  ;;  %2033 = vst [vmem:[%s2875_s6 + $0x70] sm:$0xff] %v1112_v10   ;;  %2302 = vmatprep.mubr.bf16.mxu0 %v1112_v10 }
 0x175   :  { %v1065_v11 = vadd.f32 %v2685_v22, %v959_v9  ;;  %v1096_v12 = vmax.f32 %v1064_v21, 0.0 }
 0x177   :  { %v1097_v16 = vmax.f32 %v1065_v11, 0.0 }
 0x179   :  { %v1113_v44 = vpack.c.bf16 %v1097_v16, %v1096_v12 }
 0x17b   :  { %2034 = vst [vmem:[%s2875_s6 + $0x78] sm:$0xff] %v1113_v44   ;;  %2303 = vmatmul.mubr.bf16.gmra.mrb[60].mxu0 %v1113_v44 }
 0x1de   :  { %v2276_v15 = vpop.f32.mrb[32].mxu0 }
 0x1df   :  { %v1356_v14 = vpop.f32.mrb[33].mxu0 }
 0x1e0   :  { %v2277_v18 = vpop.f32.mrb[34].mxu0 }
 0x1e1   :  { %v1948_v19 = vpack.c.bf16 %v2277_v18, %v2276_v15  ;;  %v1359_v20 = vpop.f32.mrb[35].mxu0 }
 0x1e2   :  { %v1943_v49 = vpack.c.bf16 %v1359_v20, %v1356_v14 }
 0x1e3   :  { %2035 = vst [vmem:[%s2876_s7 + $0x8] sm:$0xff] %v1948_v19  }
 0x1e4   :  { %1944 = vst [vmem:[%s2876_s7] sm:$0xff] %v1943_v49  }
 0x1ee   :  { %v2280_v22 = vpop.f32.mrb[36].mxu0 }
 0x1ef   :  { %v1372_v23 = vpop.f32.mrb[37].mxu0 }
 0x1f0   :  { %v2281_v24 = vpop.f32.mrb[38].mxu0 }
 0x1f1   :  { %v1958_v26 = vpack.c.bf16 %v2281_v24, %v2280_v22  ;;  %v1375_v28 = vpop.f32.mrb[39].mxu0 }
 0x1f2   :  { %v1953_v29 = vpack.c.bf16 %v1375_v28, %v1372_v23 }
 0x1f3   :  { %2037 = vst [vmem:[%s2876_s7 + $0x18] sm:$0xff] %v1958_v26  }
 0x1f4   :  { %2036 = vst [vmem:[%s2876_s7 + $0x10] sm:$0xff] %v1953_v29  }
 0x1fe   :  { %v2284_v7 = vpop.f32.mrb[40].mxu0 }
 0x1ff   :  { %v1388_v30 = vpop.f32.mrb[41].mxu0 }
 0x200   :  { %v2285_v33 = vpop.f32.mrb[42].mxu0 }
 0x201   :  { %v1968_v42 = vpack.c.bf16 %v2285_v33, %v2284_v7  ;;  %v1391_v34 = vpop.f32.mrb[43].mxu0 }
 0x202   :  { %v1963_v35 = vpack.c.bf16 %v1391_v34, %v1388_v30 }
 0x203   :  { %2039 = vst [vmem:[%s2876_s7 + $0x28] sm:$0xff] %v1968_v42  }
 0x204   :  { %2038 = vst [vmem:[%s2876_s7 + $0x20] sm:$0xff] %v1963_v35  }
 0x20e   :  { %v2288_v36 = vpop.f32.mrb[44].mxu0 }
 0x20f   :  { %v1404_v48 = vpop.f32.mrb[45].mxu0 }
 0x210   :  { %v2289_v37 = vpop.f32.mrb[46].mxu0 }
 0x211   :  { %v1978_v38 = vpack.c.bf16 %v2289_v37, %v2288_v36  ;;  %v1407_v13 = vpop.f32.mrb[47].mxu0 }
 0x212   :  { %v1973_v39 = vpack.c.bf16 %v1407_v13, %v1404_v48 }
 0x213   :  { %2041 = vst [vmem:[%s2876_s7 + $0x38] sm:$0xff] %v1978_v38  }
 0x214   :  { %2040 = vst [vmem:[%s2876_s7 + $0x30] sm:$0xff] %v1973_v39  }
 0x21e   :  { %v2292_v40 = vpop.f32.mrb[48].mxu0 }
 0x21f   :  { %v1420_v41 = vpop.f32.mrb[49].mxu0 }
 0x220   :  { %v2293_v43 = vpop.f32.mrb[50].mxu0 }
 0x221   :  { %v1988_v45 = vpack.c.bf16 %v2293_v43, %v2292_v40  ;;  %v1423_v62 = vpop.f32.mrb[51].mxu0 }
 0x222   :  { %v1983_v46 = vpack.c.bf16 %v1423_v62, %v1420_v41 }
 0x223   :  { %2043 = vst [vmem:[%s2876_s7 + $0x48] sm:$0xff] %v1988_v45  }
 0x224   :  { %2042 = vst [vmem:[%s2876_s7 + $0x40] sm:$0xff] %v1983_v46  }
 0x22e   :  { %v2296_v47 = vpop.f32.mrb[52].mxu0 }
 0x22f   :  { %v1436_v50 = vpop.f32.mrb[53].mxu0 }
 0x230   :  { %v2297_v2 = vpop.f32.mrb[54].mxu0 }
 0x231   :  { %v1998_v27 = vpack.c.bf16 %v2297_v2, %v2296_v47  ;;  %v1439_v51 = vpop.f32.mrb[55].mxu0 }
 0x232   :  { %v1993_v52 = vpack.c.bf16 %v1439_v51, %v1436_v50 }
 0x233   :  { %2045 = vst [vmem:[%s2876_s7 + $0x58] sm:$0xff] %v1998_v27  }
 0x234   :  { %2044 = vst [vmem:[%s2876_s7 + $0x50] sm:$0xff] %v1993_v52  }
 0x23e   :  { %v2300_v53 = vpop.f32.mrb[56].mxu0 }
 0x23f   :  { %v1452_v32 = vpop.f32.mrb[57].mxu0 }
 0x240   :  { %v2301_v55 = vpop.f32.mrb[58].mxu0 }
 0x241   :  { %v2008_v56 = vpack.c.bf16 %v2301_v55, %v2300_v53  ;;  %v1455_v54 = vpop.f32.mrb[59].mxu0 }
 0x242   :  { %v2003_v59 = vpack.c.bf16 %v1455_v54, %v1452_v32 }
 0x243   :  { %2047 = vst [vmem:[%s2876_s7 + $0x68] sm:$0xff] %v2008_v56  }
 0x244   :  { %2046 = vst [vmem:[%s2876_s7 + $0x60] sm:$0xff] %v2003_v59  }
 0x24e   :  { %v2304_v57 = vpop.f32.mrb[60].mxu0 }
 0x24f   :  { %v1468_v58 = vpop.f32.mrb[61].mxu0 }
 0x250   :  { %v2305_v61 = vpop.f32.mrb[62].mxu0 }
 0x251   :  { %v2018_v1 = vpack.c.bf16 %v2305_v61, %v2304_v57  ;;  %v1471_v63 = vpop.f32.mrb[63].mxu0 }
 0x252   :  { %v2013_v60 = vpack.c.bf16 %v1471_v63, %v1468_v58 }
 0x253   :  { %2049 = vst [vmem:[%s2876_s7 + $0x78] sm:$0xff] %v2018_v1  }
 0x254   :  { %2048 = vst [vmem:[%s2876_s7 + $0x70] sm:$0xff] %v2013_v60  }

</bundles_post_ra>
